<compile_context>
chip_gen: v5e
topology: v5e:2x2
jax: 0.10.0
libtpu: 0.0.40
codegen_flags: <defaults>
</compile_context>

<pallas_src>
import jax
import jax.numpy as jnp
from jax import lax
from jax.experimental import pallas as pl
from jax.experimental.pallas import tpu as pltpu

HIDDEN_DIM = 32
NUM_LAYERS = 2          # hard-coded as layer-0 / layer-1 inside the kernel
OUTPUT_DIM = 1

_UNROLL_T_MAX = 32      # max timesteps per chunk (fully unrolled)


def _make_kernel(t_chunk, Bp, H):
    """Kernel closure for static (chunk length, padded batch, hidden) sizes."""

    def kernel(g0_ref,                       # (t_chunk*Bp, 4H) pre-projected layer-0 gates
               whh0_ref,                     # (H, 4H)
               wih1_ref, whh1_ref, b1_ref,   # layer 1: (H,4H), (H,4H), (1,4H)
               out_ref,                      # (t_chunk*Bp, H) top-layer hidden states
               h0_sc, c0_sc, h1_sc, c1_sc):  # VMEM carries (Bp, H), persist across chunks
        # ---- init carries on the very first chunk only.
        @pl.when(pl.program_id(0) == 0)
        def _():
            z = jnp.zeros((Bp, H), jnp.float32)
            h0_sc[...] = z
            c0_sc[...] = z
            h1_sc[...] = z
            c1_sc[...] = z

        whh0 = whh0_ref[...]
        wih1 = wih1_ref[...]
        whh1 = whh1_ref[...]
        b1 = b1_ref[...]

        # Hoisted lane mask / pre-scale.  PyTorch gate order is i, f, g, o.
        # One tanh pass per layer: sigmoid(x) = 0.5 * (1 + tanh(x/2)), so scale
        # the i/f/o lanes by 0.5 before the tanh and fix them up afterwards.
        lane = lax.broadcasted_iota(jnp.int32, (Bp, 4 * H), 1)
        is_g = (lane >= 2 * H) & (lane < 3 * H)
        pre_scale = jnp.where(is_g, jnp.float32(1.0), jnp.float32(0.5))

        def gate_math(gates, c):
            t = jnp.tanh(gates * pre_scale)                 # single EUP pass
            act = jnp.where(is_g, t, 0.5 * t + 0.5)         # tanh / sigmoid lanes
            i = act[:, 0 * H:1 * H]
            f = act[:, 1 * H:2 * H]
            g = act[:, 2 * H:3 * H]
            o = act[:, 3 * H:4 * H]
            c_new = f * c + i * g
            h_new = o * jnp.tanh(c_new)
            return h_new, c_new

        h0 = h0_sc[...]
        c0 = c0_sc[...]
        h1 = h1_sc[...]
        c1 = c1_sc[...]

        # Fully unrolled chunk loop (straight-line code: Mosaic can keep the
        # recurrent weights latched and overlap layer-0(t+1) with layer-1(t)).
        for t in range(t_chunk):
            base = t * Bp
            # layer 0: recurrent half only (input projection hoisted to wrapper).
            g0 = g0_ref[pl.ds(base, Bp), :] + jnp.dot(
                h0, whh0, preferred_element_type=jnp.float32)
            h0, c0 = gate_math(g0, c0)
            # layer 1: two accumulating K=32 matmuls, no lane concat.
            g1 = (jnp.dot(h0, wih1, preferred_element_type=jnp.float32)
                  + jnp.dot(h1, whh1, preferred_element_type=jnp.float32)
                  + b1)
            h1, c1 = gate_math(g1, c1)
            out_ref[pl.ds(base, Bp), :] = h1

        # Persist carries for the next chunk.
        h0_sc[...] = h0
        c0_sc[...] = c0
        h1_sc[...] = h1
        c1_sc[...] = c1

    return kernel


def lstm_forward(x, params):
    """x: (B, T, D) float32 -> (B, T, 1) float32 (matches the PyTorch module)."""
    B, T, D = x.shape
    H = HIDDEN_DIM
    Bp = max(8, ((B + 7) // 8) * 8)          # pad batch to f32 sublane count

    # ---- chunk sizing: <=32 steps per chunk, keep the gates block modest.
    t_chunk = min(_UNROLL_T_MAX, T)
    while t_chunk > 1 and 2 * t_chunk * Bp * 4 * H * 4 > (8 << 20):
        t_chunk = max(1, t_chunk // 2)
    Tp = ((T + t_chunk - 1) // t_chunk) * t_chunk
    n_chunks = Tp // t_chunk
    chunk_rows = t_chunk * Bp

    # ---- time-major, padded (padding sits at the end of time / batch).
    x_tm = jnp.transpose(x, (1, 0, 2))                       # (T, B, D)
    x_tm = jnp.pad(x_tm, ((0, Tp - T), (0, Bp - B), (0, 0)))
    x_flat = x_tm.reshape(Tp * Bp, D)

    # ---- parameters (PyTorch layout -> matmul-friendly transposes).
    wih0_t = params["w_ih_l0"].T                              # (D, 4H)
    whh0_t = params["w_hh_l0"].T                              # (H, 4H)
    b0 = (params["b_ih_l0"] + params["b_hh_l0"]).reshape(1, 4 * H)
    wih1_t = params["w_ih_l1"].T                              # (H, 4H)
    whh1_t = params["w_hh_l1"].T                              # (H, 4H)
    b1 = (params["b_ih_l1"] + params["b_hh_l1"]).reshape(1, 4 * H)

    # Hoisted, lane-dense layer-0 input projection (no recurrent dependency):
    # one big XLA matmul; the kernel input becomes a dense (rows, 128) block.
    gates0 = x_flat @ wih0_t + b0                             # (Tp*Bp, 4H)

    kernel = _make_kernel(t_chunk, Bp, H)

    # Explicit VMEM budget (double-buffered blocks + weights + carries), with
    # headroom; stays well under v7x's 64 MiB physical cap.
    vmem_need = (2 * chunk_rows * 4 * H * 4       # gates0 blocks (x2 buffers)
                 + 2 * chunk_rows * H * 4         # output blocks (x2 buffers)
                 + 4 * Bp * H * 4                 # carries
                 + 3 * H * 4 * H * 4 + 4 * H * 4) # weights + bias
    vmem_limit = int(min(max(4 * vmem_need, 8 << 20), 48 << 20))

    h1_flat = pl.pallas_call(
        kernel,
        out_shape=jax.ShapeDtypeStruct((Tp * Bp, H), jnp.float32),
        grid_spec=pltpu.PrefetchScalarGridSpec(
            num_scalar_prefetch=0,
            grid=(n_chunks,),                     # serial over time chunks
            in_specs=[
                pl.BlockSpec((chunk_rows, 4 * H), lambda i: (i, 0)),
                pl.BlockSpec((H, 4 * H), lambda i: (0, 0)),
                pl.BlockSpec((H, 4 * H), lambda i: (0, 0)),
                pl.BlockSpec((H, 4 * H), lambda i: (0, 0)),
                pl.BlockSpec((1, 4 * H), lambda i: (0, 0)),
            ],
            out_specs=pl.BlockSpec((chunk_rows, H), lambda i: (i, 0)),
            scratch_shapes=[pltpu.VMEM((Bp, H), jnp.float32)] * 4,
        ),
        compiler_params=pltpu.CompilerParams(
            dimension_semantics=("arbitrary",),   # recurrence carries across chunks
            vmem_limit_bytes=vmem_limit,
        ),
    )(gates0, whh0_t, wih1_t, whh1_t, b1)

    # fc head as one dense XLA matmul; drop time/batch padding.
    h1 = h1_flat.reshape(Tp, Bp, H)[:T, :B, :]                # (T, B, H)
    out = h1 @ params["fc_w"].T + params["fc_b"]              # (T, B, 1)
    return jnp.transpose(out, (1, 0, 2))                      # (B, T, 1)


def init_params(key, input_dim, hidden_dim):
    """Deterministic init matching PyTorch LSTM/Linear parameter shapes."""
    H = hidden_dim
    k = 1.0 / jnp.sqrt(jnp.asarray(H, jnp.float32))
    keys = jax.random.split(key, 10)
    u = lambda kk, shape: jax.random.uniform(kk, shape, jnp.float32, -k, k)
    return {
        "w_ih_l0": u(keys[0], (4 * H, input_dim)),
        "w_hh_l0": u(keys[1], (4 * H, H)),
        "b_ih_l0": u(keys[2], (4 * H,)),
        "b_hh_l0": u(keys[3], (4 * H,)),
        "w_ih_l1": u(keys[4], (4 * H, H)),
        "w_hh_l1": u(keys[5], (4 * H, H)),
        "b_ih_l1": u(keys[6], (4 * H,)),
        "b_hh_l1": u(keys[7], (4 * H,)),
        "fc_w":    u(keys[8], (OUTPUT_DIM, H)),
        "fc_b":    u(keys[9], (OUTPUT_DIM,)),
    }


def lstm_reference(x, params):
    """Pure-JAX reference of the same forward pass (for sanity checking)."""
    B, T, D = x.shape
    H = HIDDEN_DIM

    def cell(x_t, h, c, w_ih, w_hh, b_ih, b_hh):
        g = x_t @ w_ih.T + h @ w_hh.T + b_ih + b_hh
        i, f, gg, o = jnp.split(g, 4, axis=-1)
        c_new = jax.nn.sigmoid(f) * c + jax.nn.sigmoid(i) * jnp.tanh(gg)
        h_new = jax.nn.sigmoid(o) * jnp.tanh(c_new)
        return h_new, c_new

    def step(carry, x_t):
        h0, c0, h1, c1 = carry
        h0, c0 = cell(x_t, h0, c0, params["w_ih_l0"], params["w_hh_l0"],
                      params["b_ih_l0"], params["b_hh_l0"])
        h1, c1 = cell(h0, h1, c1, params["w_ih_l1"], params["w_hh_l1"],
                      params["b_ih_l1"], params["b_hh_l1"])
        return (h0, c0, h1, c1), h1

    z = jnp.zeros((B, H), jnp.float32)
    _, hs = jax.lax.scan(step, (z, z, z, z), jnp.transpose(x, (1, 0, 2)))
    out = hs @ params["fc_w"].T + params["fc_b"]              # (T, B, 1)
    return jnp.transpose(out, (1, 0, 2))


if __name__ == "__main__":
    B, T, D = 2, 8, 8          # batch, sequence length, input features
    key = jax.random.PRNGKey(0)
    kx, kp = jax.random.split(key)
    x = jax.random.normal(kx, (B, T, D), jnp.float32)
    params = init_params(kp, D, HIDDEN_DIM)

    out = lstm_forward(x, params)
    jax.block_until_ready(out)

    ref = lstm_reference(x, params)
    assert out.shape == (B, T, OUTPUT_DIM)
    assert jnp.allclose(out, ref, atol=1e-4, rtol=1e-4)

    # Also exercise the multi-chunk path (T > chunk, T not a multiple of chunk).
    B2, T2 = 4, 70
    x2 = jax.random.normal(jax.random.PRNGKey(1), (B2, T2, D), jnp.float32)
    out2 = lstm_forward(x2, params)
    jax.block_until_ready(out2)
    ref2 = lstm_reference(x2, params)
    assert out2.shape == (B2, T2, OUTPUT_DIM)
    assert jnp.allclose(out2, ref2, atol=1e-4, rtol=1e-4)

    print("KERNEL_OK")
</pallas_src>

<mosaic_0001>
module attributes {stable_mosaic.version = 11 : i64} {
  func.func @kernel(%arg0: i32, %arg1: memref<64x128xf32, #tpu.memory_space<vmem>>, %arg2: memref<32x128xf32, #tpu.memory_space<vmem>>, %arg3: memref<32x128xf32, #tpu.memory_space<vmem>>, %arg4: memref<32x128xf32, #tpu.memory_space<vmem>>, %arg5: memref<1x128xf32, #tpu.memory_space<vmem>>, %arg6: memref<64x32xf32, #tpu.memory_space<vmem>>, %arg7: memref<8x32xf32, #tpu.memory_space<vmem>>, %arg8: memref<8x32xf32, #tpu.memory_space<vmem>>, %arg9: memref<8x32xf32, #tpu.memory_space<vmem>>, %arg10: memref<8x32xf32, #tpu.memory_space<vmem>>) attributes {dimension_semantics = [#tpu.dimension_semantics<arbitrary>], iteration_bounds = array<i64: 1>, scalar_prefetch = 0 : i64, scratch_operands = 4 : i64, tpu.core_type = #tpu.core_type<tc>, window_params = [{transform_indices = @transform_0, window_bounds = array<i64: 64, 128>}, {pipeline_mode = #tpu.pipeline_mode<synchronous>, transform_indices = @transform_1, window_bounds = array<i64: 32, 128>}, {pipeline_mode = #tpu.pipeline_mode<synchronous>, transform_indices = @transform_2, window_bounds = array<i64: 32, 128>}, {pipeline_mode = #tpu.pipeline_mode<synchronous>, transform_indices = @transform_3, window_bounds = array<i64: 32, 128>}, {pipeline_mode = #tpu.pipeline_mode<synchronous>, transform_indices = @transform_4, window_bounds = array<i64: 1, 128>}, {transform_indices = @transform_5, window_bounds = array<i64: 64, 32>}]} {
    %c0_i32 = arith.constant 0 : i32
    %0 = arith.cmpi eq, %arg0, %c0_i32 : i32
    %1 = arith.extui %0 : i1 to i32
    %c0_i32_0 = arith.constant 0 : i32
    %2 = arith.cmpi ne, %1, %c0_i32_0 : i32
    scf.if %2 {
      %cst_106 = arith.constant 0.000000e+00 : f32
      %352 = vector.broadcast %cst_106 : f32 to vector<8x32xf32>
      %c0_107 = arith.constant 0 : index
      %c0_108 = arith.constant 0 : index
      %353 = vector.load %arg7[%c0_107, %c0_108] : memref<8x32xf32, #tpu.memory_space<vmem>>, vector<8x32xf32>
      tpu.vector_store %arg7[%c0_107, %c0_108], %352 {strides = array<i32>} : memref<8x32xf32, #tpu.memory_space<vmem>>, vector<8x32xf32>,
      %c0_109 = arith.constant 0 : index
      %c0_110 = arith.constant 0 : index
      %354 = vector.load %arg8[%c0_109, %c0_110] : memref<8x32xf32, #tpu.memory_space<vmem>>, vector<8x32xf32>
      tpu.vector_store %arg8[%c0_109, %c0_110], %352 {strides = array<i32>} : memref<8x32xf32, #tpu.memory_space<vmem>>, vector<8x32xf32>,
      %c0_111 = arith.constant 0 : index
      %c0_112 = arith.constant 0 : index
      %355 = vector.load %arg9[%c0_111, %c0_112] : memref<8x32xf32, #tpu.memory_space<vmem>>, vector<8x32xf32>
      tpu.vector_store %arg9[%c0_111, %c0_112], %352 {strides = array<i32>} : memref<8x32xf32, #tpu.memory_space<vmem>>, vector<8x32xf32>,
      %c0_113 = arith.constant 0 : index
      %c0_114 = arith.constant 0 : index
      %356 = vector.load %arg10[%c0_113, %c0_114] : memref<8x32xf32, #tpu.memory_space<vmem>>, vector<8x32xf32>
      tpu.vector_store %arg10[%c0_113, %c0_114], %352 {strides = array<i32>} : memref<8x32xf32, #tpu.memory_space<vmem>>, vector<8x32xf32>,
    } else {
    }
    %c0 = arith.constant 0 : index
    %c0_1 = arith.constant 0 : index
    %3 = vector.load %arg2[%c0, %c0_1] : memref<32x128xf32, #tpu.memory_space<vmem>>, vector<32x128xf32>
    %c0_2 = arith.constant 0 : index
    %c0_3 = arith.constant 0 : index
    %4 = vector.load %arg3[%c0_2, %c0_3] : memref<32x128xf32, #tpu.memory_space<vmem>>, vector<32x128xf32>
    %c0_4 = arith.constant 0 : index
    %c0_5 = arith.constant 0 : index
    %5 = vector.load %arg4[%c0_4, %c0_5] : memref<32x128xf32, #tpu.memory_space<vmem>>, vector<32x128xf32>
    %c0_6 = arith.constant 0 : index
    %c0_7 = arith.constant 0 : index
    %6 = vector.load %arg5[%c0_6, %c0_7] : memref<1x128xf32, #tpu.memory_space<vmem>>, vector<1x128xf32>
    %7 = tpu.iota {dimensions = array<i32: 1>} : vector<8x128xi32>
    %c64_i32 = arith.constant 64 : i32
    %8 = vector.broadcast %c64_i32 : i32 to vector<8x128xi32>
    %9 = arith.cmpi sge, %7, %8 : vector<8x128xi32>
    %c96_i32 = arith.constant 96 : i32
    %10 = vector.broadcast %c96_i32 : i32 to vector<8x128xi32>
    %11 = arith.cmpi slt, %7, %10 : vector<8x128xi32>
    %12 = arith.andi %9, %11 : vector<8x128xi1>
    %cst = arith.constant 1.000000e+00 : f32
    %cst_8 = arith.constant 5.000000e-01 : f32
    %13 = vector.broadcast %cst : f32 to vector<8x128xf32>
    %14 = vector.broadcast %cst_8 : f32 to vector<8x128xf32>
    %15 = arith.select %12, %13, %14 : vector<8x128xi1>, vector<8x128xf32>
    %c0_9 = arith.constant 0 : index
    %c0_10 = arith.constant 0 : index
    %16 = vector.load %arg7[%c0_9, %c0_10] : memref<8x32xf32, #tpu.memory_space<vmem>>, vector<8x32xf32>
    %c0_11 = arith.constant 0 : index
    %c0_12 = arith.constant 0 : index
    %17 = vector.load %arg8[%c0_11, %c0_12] : memref<8x32xf32, #tpu.memory_space<vmem>>, vector<8x32xf32>
    %c0_13 = arith.constant 0 : index
    %c0_14 = arith.constant 0 : index
    %18 = vector.load %arg9[%c0_13, %c0_14] : memref<8x32xf32, #tpu.memory_space<vmem>>, vector<8x32xf32>
    %c0_15 = arith.constant 0 : index
    %c0_16 = arith.constant 0 : index
    %19 = vector.load %arg10[%c0_15, %c0_16] : memref<8x32xf32, #tpu.memory_space<vmem>>, vector<8x32xf32>
    %c0_17 = arith.constant 0 : index
    %c0_18 = arith.constant 0 : index
    %20 = vector.load %arg1[%c0_17, %c0_18] : memref<64x128xf32, #tpu.memory_space<vmem>>, vector<8x128xf32>
    %cst_19 = arith.constant dense<0.000000e+00> : vector<8x128xf32>
    %21 = tpu.matmul %16, %3, %cst_19 {dimension_numbers = #tpu.dot_dimension_numbers<[1], [0], [0], [1], [0, 0, 1, 1], [], []>} : vector<8x32xf32>, vector<32x128xf32>, vector<8x128xf32> -> vector<8x128xf32>
    %22 = arith.addf %20, %21 : vector<8x128xf32>
    %23 = arith.mulf %22, %15 : vector<8x128xf32>
    %24 = math.tanh %23 : vector<8x128xf32>
    %cst_20 = arith.constant 5.000000e-01 : f32
    %25 = vector.broadcast %cst_20 : f32 to vector<8x128xf32>
    %26 = arith.mulf %25, %24 : vector<8x128xf32>
    %cst_21 = arith.constant 5.000000e-01 : f32
    %27 = vector.broadcast %cst_21 : f32 to vector<8x128xf32>
    %28 = arith.addf %26, %27 : vector<8x128xf32>
    %29 = arith.select %12, %24, %28 : vector<8x128xi1>, vector<8x128xf32>
    %30 = vector.extract_strided_slice %29 {offsets = [0, 0], sizes = [8, 32], strides = [1, 1]} : vector<8x128xf32> to vector<8x32xf32>
    %31 = vector.extract_strided_slice %29 {offsets = [0, 32], sizes = [8, 32], strides = [1, 1]} : vector<8x128xf32> to vector<8x32xf32>
    %32 = vector.extract_strided_slice %29 {offsets = [0, 64], sizes = [8, 32], strides = [1, 1]} : vector<8x128xf32> to vector<8x32xf32>
    %33 = vector.extract_strided_slice %29 {offsets = [0, 96], sizes = [8, 32], strides = [1, 1]} : vector<8x128xf32> to vector<8x32xf32>
    %34 = arith.mulf %31, %17 : vector<8x32xf32>
    %35 = arith.mulf %30, %32 : vector<8x32xf32>
    %36 = arith.addf %34, %35 : vector<8x32xf32>
    %37 = math.tanh %36 : vector<8x32xf32>
    %38 = arith.mulf %33, %37 : vector<8x32xf32>
    %cst_22 = arith.constant dense<0.000000e+00> : vector<8x128xf32>
    %39 = tpu.matmul %38, %4, %cst_22 {dimension_numbers = #tpu.dot_dimension_numbers<[1], [0], [0], [1], [0, 0, 1, 1], [], []>} : vector<8x32xf32>, vector<32x128xf32>, vector<8x128xf32> -> vector<8x128xf32>
    %cst_23 = arith.constant dense<0.000000e+00> : vector<8x128xf32>
    %40 = tpu.matmul %18, %5, %cst_23 {dimension_numbers = #tpu.dot_dimension_numbers<[1], [0], [0], [1], [0, 0, 1, 1], [], []>} : vector<8x32xf32>, vector<32x128xf32>, vector<8x128xf32> -> vector<8x128xf32>
    %41 = arith.addf %39, %40 : vector<8x128xf32>
    %42 = vector.broadcast %6 : vector<1x128xf32> to vector<8x128xf32>
    %43 = arith.addf %41, %42 : vector<8x128xf32>
    %44 = arith.mulf %43, %15 : vector<8x128xf32>
    %45 = math.tanh %44 : vector<8x128xf32>
    %cst_24 = arith.constant 5.000000e-01 : f32
    %46 = vector.broadcast %cst_24 : f32 to vector<8x128xf32>
    %47 = arith.mulf %46, %45 : vector<8x128xf32>
    %cst_25 = arith.constant 5.000000e-01 : f32
    %48 = vector.broadcast %cst_25 : f32 to vector<8x128xf32>
    %49 = arith.addf %47, %48 : vector<8x128xf32>
    %50 = arith.select %12, %45, %49 : vector<8x128xi1>, vector<8x128xf32>
    %51 = vector.extract_strided_slice %50 {offsets = [0, 0], sizes = [8, 32], strides = [1, 1]} : vector<8x128xf32> to vector<8x32xf32>
    %52 = vector.extract_strided_slice %50 {offsets = [0, 32], sizes = [8, 32], strides = [1, 1]} : vector<8x128xf32> to vector<8x32xf32>
    %53 = vector.extract_strided_slice %50 {offsets = [0, 64], sizes = [8, 32], strides = [1, 1]} : vector<8x128xf32> to vector<8x32xf32>
    %54 = vector.extract_strided_slice %50 {offsets = [0, 96], sizes = [8, 32], strides = [1, 1]} : vector<8x128xf32> to vector<8x32xf32>
    %55 = arith.mulf %52, %19 : vector<8x32xf32>
    %56 = arith.mulf %51, %53 : vector<8x32xf32>
    %57 = arith.addf %55, %56 : vector<8x32xf32>
    %58 = math.tanh %57 : vector<8x32xf32>
    %59 = arith.mulf %54, %58 : vector<8x32xf32>
    %c0_26 = arith.constant 0 : index
    %c0_27 = arith.constant 0 : index
    %60 = vector.load %arg6[%c0_26, %c0_27] : memref<64x32xf32, #tpu.memory_space<vmem>>, vector<8x32xf32>
    tpu.vector_store %arg6[%c0_26, %c0_27], %59 {strides = array<i32>} : memref<64x32xf32, #tpu.memory_space<vmem>>, vector<8x32xf32>,
    %c8 = arith.constant 8 : index
    %c0_28 = arith.constant 0 : index
    %61 = vector.load %arg1[%c8, %c0_28] : memref<64x128xf32, #tpu.memory_space<vmem>>, vector<8x128xf32>
    %cst_29 = arith.constant dense<0.000000e+00> : vector<8x128xf32>
    %62 = tpu.matmul %38, %3, %cst_29 {dimension_numbers = #tpu.dot_dimension_numbers<[1], [0], [0], [1], [0, 0, 1, 1], [], []>} : vector<8x32xf32>, vector<32x128xf32>, vector<8x128xf32> -> vector<8x128xf32>
    %63 = arith.addf %61, %62 : vector<8x128xf32>
    %64 = arith.mulf %63, %15 : vector<8x128xf32>
    %65 = math.tanh %64 : vector<8x128xf32>
    %cst_30 = arith.constant 5.000000e-01 : f32
    %66 = vector.broadcast %cst_30 : f32 to vector<8x128xf32>
    %67 = arith.mulf %66, %65 : vector<8x128xf32>
    %cst_31 = arith.constant 5.000000e-01 : f32
    %68 = vector.broadcast %cst_31 : f32 to vector<8x128xf32>
    %69 = arith.addf %67, %68 : vector<8x128xf32>
    %70 = arith.select %12, %65, %69 : vector<8x128xi1>, vector<8x128xf32>
    %71 = vector.extract_strided_slice %70 {offsets = [0, 0], sizes = [8, 32], strides = [1, 1]} : vector<8x128xf32> to vector<8x32xf32>
    %72 = vector.extract_strided_slice %70 {offsets = [0, 32], sizes = [8, 32], strides = [1, 1]} : vector<8x128xf32> to vector<8x32xf32>
    %73 = vector.extract_strided_slice %70 {offsets = [0, 64], sizes = [8, 32], strides = [1, 1]} : vector<8x128xf32> to vector<8x32xf32>
    %74 = vector.extract_strided_slice %70 {offsets = [0, 96], sizes = [8, 32], strides = [1, 1]} : vector<8x128xf32> to vector<8x32xf32>
    %75 = arith.mulf %72, %36 : vector<8x32xf32>
    %76 = arith.mulf %71, %73 : vector<8x32xf32>
    %77 = arith.addf %75, %76 : vector<8x32xf32>
    %78 = math.tanh %77 : vector<8x32xf32>
    %79 = arith.mulf %74, %78 : vector<8x32xf32>
    %cst_32 = arith.constant dense<0.000000e+00> : vector<8x128xf32>
    %80 = tpu.matmul %79, %4, %cst_32 {dimension_numbers = #tpu.dot_dimension_numbers<[1], [0], [0], [1], [0, 0, 1, 1], [], []>} : vector<8x32xf32>, vector<32x128xf32>, vector<8x128xf32> -> vector<8x128xf32>
    %cst_33 = arith.constant dense<0.000000e+00> : vector<8x128xf32>
    %81 = tpu.matmul %59, %5, %cst_33 {dimension_numbers = #tpu.dot_dimension_numbers<[1], [0], [0], [1], [0, 0, 1, 1], [], []>} : vector<8x32xf32>, vector<32x128xf32>, vector<8x128xf32> -> vector<8x128xf32>
    %82 = arith.addf %80, %81 : vector<8x128xf32>
    %83 = vector.broadcast %6 : vector<1x128xf32> to vector<8x128xf32>
    %84 = arith.addf %82, %83 : vector<8x128xf32>
    %85 = arith.mulf %84, %15 : vector<8x128xf32>
    %86 = math.tanh %85 : vector<8x128xf32>
    %cst_34 = arith.constant 5.000000e-01 : f32
    %87 = vector.broadcast %cst_34 : f32 to vector<8x128xf32>
    %88 = arith.mulf %87, %86 : vector<8x128xf32>
    %cst_35 = arith.constant 5.000000e-01 : f32
    %89 = vector.broadcast %cst_35 : f32 to vector<8x128xf32>
    %90 = arith.addf %88, %89 : vector<8x128xf32>
    %91 = arith.select %12, %86, %90 : vector<8x128xi1>, vector<8x128xf32>
    %92 = vector.extract_strided_slice %91 {offsets = [0, 0], sizes = [8, 32], strides = [1, 1]} : vector<8x128xf32> to vector<8x32xf32>
    %93 = vector.extract_strided_slice %91 {offsets = [0, 32], sizes = [8, 32], strides = [1, 1]} : vector<8x128xf32> to vector<8x32xf32>
    %94 = vector.extract_strided_slice %91 {offsets = [0, 64], sizes = [8, 32], strides = [1, 1]} : vector<8x128xf32> to vector<8x32xf32>
    %95 = vector.extract_strided_slice %91 {offsets = [0, 96], sizes = [8, 32], strides = [1, 1]} : vector<8x128xf32> to vector<8x32xf32>
    %96 = arith.mulf %93, %57 : vector<8x32xf32>
    %97 = arith.mulf %92, %94 : vector<8x32xf32>
    %98 = arith.addf %96, %97 : vector<8x32xf32>
    %99 = math.tanh %98 : vector<8x32xf32>
    %100 = arith.mulf %95, %99 : vector<8x32xf32>
    %c8_36 = arith.constant 8 : index
    %c0_37 = arith.constant 0 : index
    %101 = vector.load %arg6[%c8_36, %c0_37] : memref<64x32xf32, #tpu.memory_space<vmem>>, vector<8x32xf32>
    tpu.vector_store %arg6[%c8_36, %c0_37], %100 {strides = array<i32>} : memref<64x32xf32, #tpu.memory_space<vmem>>, vector<8x32xf32>,
    %c16 = arith.constant 16 : index
    %c0_38 = arith.constant 0 : index
    %102 = vector.load %arg1[%c16, %c0_38] : memref<64x128xf32, #tpu.memory_space<vmem>>, vector<8x128xf32>
    %cst_39 = arith.constant dense<0.000000e+00> : vector<8x128xf32>
    %103 = tpu.matmul %79, %3, %cst_39 {dimension_numbers = #tpu.dot_dimension_numbers<[1], [0], [0], [1], [0, 0, 1, 1], [], []>} : vector<8x32xf32>, vector<32x128xf32>, vector<8x128xf32> -> vector<8x128xf32>
    %104 = arith.addf %102, %103 : vector<8x128xf32>
    %105 = arith.mulf %104, %15 : vector<8x128xf32>
    %106 = math.tanh %105 : vector<8x128xf32>
    %cst_40 = arith.constant 5.000000e-01 : f32
    %107 = vector.broadcast %cst_40 : f32 to vector<8x128xf32>
    %108 = arith.mulf %107, %106 : vector<8x128xf32>
    %cst_41 = arith.constant 5.000000e-01 : f32
    %109 = vector.broadcast %cst_41 : f32 to vector<8x128xf32>
    %110 = arith.addf %108, %109 : vector<8x128xf32>
    %111 = arith.select %12, %106, %110 : vector<8x128xi1>, vector<8x128xf32>
    %112 = vector.extract_strided_slice %111 {offsets = [0, 0], sizes = [8, 32], strides = [1, 1]} : vector<8x128xf32> to vector<8x32xf32>
    %113 = vector.extract_strided_slice %111 {offsets = [0, 32], sizes = [8, 32], strides = [1, 1]} : vector<8x128xf32> to vector<8x32xf32>
    %114 = vector.extract_strided_slice %111 {offsets = [0, 64], sizes = [8, 32], strides = [1, 1]} : vector<8x128xf32> to vector<8x32xf32>
    %115 = vector.extract_strided_slice %111 {offsets = [0, 96], sizes = [8, 32], strides = [1, 1]} : vector<8x128xf32> to vector<8x32xf32>
    %116 = arith.mulf %113, %77 : vector<8x32xf32>
    %117 = arith.mulf %112, %114 : vector<8x32xf32>
    %118 = arith.addf %116, %117 : vector<8x32xf32>
    %119 = math.tanh %118 : vector<8x32xf32>
    %120 = arith.mulf %115, %119 : vector<8x32xf32>
    %cst_42 = arith.constant dense<0.000000e+00> : vector<8x128xf32>
    %121 = tpu.matmul %120, %4, %cst_42 {dimension_numbers = #tpu.dot_dimension_numbers<[1], [0], [0], [1], [0, 0, 1, 1], [], []>} : vector<8x32xf32>, vector<32x128xf32>, vector<8x128xf32> -> vector<8x128xf32>
    %cst_43 = arith.constant dense<0.000000e+00> : vector<8x128xf32>
    %122 = tpu.matmul %100, %5, %cst_43 {dimension_numbers = #tpu.dot_dimension_numbers<[1], [0], [0], [1], [0, 0, 1, 1], [], []>} : vector<8x32xf32>, vector<32x128xf32>, vector<8x128xf32> -> vector<8x128xf32>
    %123 = arith.addf %121, %122 : vector<8x128xf32>
    %124 = vector.broadcast %6 : vector<1x128xf32> to vector<8x128xf32>
    %125 = arith.addf %123, %124 : vector<8x128xf32>
    %126 = arith.mulf %125, %15 : vector<8x128xf32>
    %127 = math.tanh %126 : vector<8x128xf32>
    %cst_44 = arith.constant 5.000000e-01 : f32
    %128 = vector.broadcast %cst_44 : f32 to vector<8x128xf32>
    %129 = arith.mulf %128, %127 : vector<8x128xf32>
    %cst_45 = arith.constant 5.000000e-01 : f32
    %130 = vector.broadcast %cst_45 : f32 to vector<8x128xf32>
    %131 = arith.addf %129, %130 : vector<8x128xf32>
    %132 = arith.select %12, %127, %131 : vector<8x128xi1>, vector<8x128xf32>
    %133 = vector.extract_strided_slice %132 {offsets = [0, 0], sizes = [8, 32], strides = [1, 1]} : vector<8x128xf32> to vector<8x32xf32>
    %134 = vector.extract_strided_slice %132 {offsets = [0, 32], sizes = [8, 32], strides = [1, 1]} : vector<8x128xf32> to vector<8x32xf32>
    %135 = vector.extract_strided_slice %132 {offsets = [0, 64], sizes = [8, 32], strides = [1, 1]} : vector<8x128xf32> to vector<8x32xf32>
    %136 = vector.extract_strided_slice %132 {offsets = [0, 96], sizes = [8, 32], strides = [1, 1]} : vector<8x128xf32> to vector<8x32xf32>
    %137 = arith.mulf %134, %98 : vector<8x32xf32>
    %138 = arith.mulf %133, %135 : vector<8x32xf32>
    %139 = arith.addf %137, %138 : vector<8x32xf32>
    %140 = math.tanh %139 : vector<8x32xf32>
    %141 = arith.mulf %136, %140 : vector<8x32xf32>
    %c16_46 = arith.constant 16 : index
    %c0_47 = arith.constant 0 : index
    %142 = vector.load %arg6[%c16_46, %c0_47] : memref<64x32xf32, #tpu.memory_space<vmem>>, vector<8x32xf32>
    tpu.vector_store %arg6[%c16_46, %c0_47], %141 {strides = array<i32>} : memref<64x32xf32, #tpu.memory_space<vmem>>, vector<8x32xf32>,
    %c24 = arith.constant 24 : index
    %c0_48 = arith.constant 0 : index
    %143 = vector.load %arg1[%c24, %c0_48] : memref<64x128xf32, #tpu.memory_space<vmem>>, vector<8x128xf32>
    %cst_49 = arith.constant dense<0.000000e+00> : vector<8x128xf32>
    %144 = tpu.matmul %120, %3, %cst_49 {dimension_numbers = #tpu.dot_dimension_numbers<[1], [0], [0], [1], [0, 0, 1, 1], [], []>} : vector<8x32xf32>, vector<32x128xf32>, vector<8x128xf32> -> vector<8x128xf32>
    %145 = arith.addf %143, %144 : vector<8x128xf32>
    %146 = arith.mulf %145, %15 : vector<8x128xf32>
    %147 = math.tanh %146 : vector<8x128xf32>
    %cst_50 = arith.constant 5.000000e-01 : f32
    %148 = vector.broadcast %cst_50 : f32 to vector<8x128xf32>
    %149 = arith.mulf %148, %147 : vector<8x128xf32>
    %cst_51 = arith.constant 5.000000e-01 : f32
    %150 = vector.broadcast %cst_51 : f32 to vector<8x128xf32>
    %151 = arith.addf %149, %150 : vector<8x128xf32>
    %152 = arith.select %12, %147, %151 : vector<8x128xi1>, vector<8x128xf32>
    %153 = vector.extract_strided_slice %152 {offsets = [0, 0], sizes = [8, 32], strides = [1, 1]} : vector<8x128xf32> to vector<8x32xf32>
    %154 = vector.extract_strided_slice %152 {offsets = [0, 32], sizes = [8, 32], strides = [1, 1]} : vector<8x128xf32> to vector<8x32xf32>
    %155 = vector.extract_strided_slice %152 {offsets = [0, 64], sizes = [8, 32], strides = [1, 1]} : vector<8x128xf32> to vector<8x32xf32>
    %156 = vector.extract_strided_slice %152 {offsets = [0, 96], sizes = [8, 32], strides = [1, 1]} : vector<8x128xf32> to vector<8x32xf32>
    %157 = arith.mulf %154, %118 : vector<8x32xf32>
    %158 = arith.mulf %153, %155 : vector<8x32xf32>
    %159 = arith.addf %157, %158 : vector<8x32xf32>
    %160 = math.tanh %159 : vector<8x32xf32>
    %161 = arith.mulf %156, %160 : vector<8x32xf32>
    %cst_52 = arith.constant dense<0.000000e+00> : vector<8x128xf32>
    %162 = tpu.matmul %161, %4, %cst_52 {dimension_numbers = #tpu.dot_dimension_numbers<[1], [0], [0], [1], [0, 0, 1, 1], [], []>} : vector<8x32xf32>, vector<32x128xf32>, vector<8x128xf32> -> vector<8x128xf32>
    %cst_53 = arith.constant dense<0.000000e+00> : vector<8x128xf32>
    %163 = tpu.matmul %141, %5, %cst_53 {dimension_numbers = #tpu.dot_dimension_numbers<[1], [0], [0], [1], [0, 0, 1, 1], [], []>} : vector<8x32xf32>, vector<32x128xf32>, vector<8x128xf32> -> vector<8x128xf32>
    %164 = arith.addf %162, %163 : vector<8x128xf32>
    %165 = vector.broadcast %6 : vector<1x128xf32> to vector<8x128xf32>
    %166 = arith.addf %164, %165 : vector<8x128xf32>
    %167 = arith.mulf %166, %15 : vector<8x128xf32>
    %168 = math.tanh %167 : vector<8x128xf32>
    %cst_54 = arith.constant 5.000000e-01 : f32
    %169 = vector.broadcast %cst_54 : f32 to vector<8x128xf32>
    %170 = arith.mulf %169, %168 : vector<8x128xf32>
    %cst_55 = arith.constant 5.000000e-01 : f32
    %171 = vector.broadcast %cst_55 : f32 to vector<8x128xf32>
    %172 = arith.addf %170, %171 : vector<8x128xf32>
    %173 = arith.select %12, %168, %172 : vector<8x128xi1>, vector<8x128xf32>
    %174 = vector.extract_strided_slice %173 {offsets = [0, 0], sizes = [8, 32], strides = [1, 1]} : vector<8x128xf32> to vector<8x32xf32>
    %175 = vector.extract_strided_slice %173 {offsets = [0, 32], sizes = [8, 32], strides = [1, 1]} : vector<8x128xf32> to vector<8x32xf32>
    %176 = vector.extract_strided_slice %173 {offsets = [0, 64], sizes = [8, 32], strides = [1, 1]} : vector<8x128xf32> to vector<8x32xf32>
    %177 = vector.extract_strided_slice %173 {offsets = [0, 96], sizes = [8, 32], strides = [1, 1]} : vector<8x128xf32> to vector<8x32xf32>
    %178 = arith.mulf %175, %139 : vector<8x32xf32>
    %179 = arith.mulf %174, %176 : vector<8x32xf32>
    %180 = arith.addf %178, %179 : vector<8x32xf32>
    %181 = math.tanh %180 : vector<8x32xf32>
    %182 = arith.mulf %177, %181 : vector<8x32xf32>
    %c24_56 = arith.constant 24 : index
    %c0_57 = arith.constant 0 : index
    %183 = vector.load %arg6[%c24_56, %c0_57] : memref<64x32xf32, #tpu.memory_space<vmem>>, vector<8x32xf32>
    tpu.vector_store %arg6[%c24_56, %c0_57], %182 {strides = array<i32>} : memref<64x32xf32, #tpu.memory_space<vmem>>, vector<8x32xf32>,
    %c32 = arith.constant 32 : index
    %c0_58 = arith.constant 0 : index
    %184 = vector.load %arg1[%c32, %c0_58] : memref<64x128xf32, #tpu.memory_space<vmem>>, vector<8x128xf32>
    %cst_59 = arith.constant dense<0.000000e+00> : vector<8x128xf32>
    %185 = tpu.matmul %161, %3, %cst_59 {dimension_numbers = #tpu.dot_dimension_numbers<[1], [0], [0], [1], [0, 0, 1, 1], [], []>} : vector<8x32xf32>, vector<32x128xf32>, vector<8x128xf32> -> vector<8x128xf32>
    %186 = arith.addf %184, %185 : vector<8x128xf32>
    %187 = arith.mulf %186, %15 : vector<8x128xf32>
    %188 = math.tanh %187 : vector<8x128xf32>
    %cst_60 = arith.constant 5.000000e-01 : f32
    %189 = vector.broadcast %cst_60 : f32 to vector<8x128xf32>
    %190 = arith.mulf %189, %188 : vector<8x128xf32>
    %cst_61 = arith.constant 5.000000e-01 : f32
    %191 = vector.broadcast %cst_61 : f32 to vector<8x128xf32>
    %192 = arith.addf %190, %191 : vector<8x128xf32>
    %193 = arith.select %12, %188, %192 : vector<8x128xi1>, vector<8x128xf32>
    %194 = vector.extract_strided_slice %193 {offsets = [0, 0], sizes = [8, 32], strides = [1, 1]} : vector<8x128xf32> to vector<8x32xf32>
    %195 = vector.extract_strided_slice %193 {offsets = [0, 32], sizes = [8, 32], strides = [1, 1]} : vector<8x128xf32> to vector<8x32xf32>
    %196 = vector.extract_strided_slice %193 {offsets = [0, 64], sizes = [8, 32], strides = [1, 1]} : vector<8x128xf32> to vector<8x32xf32>
    %197 = vector.extract_strided_slice %193 {offsets = [0, 96], sizes = [8, 32], strides = [1, 1]} : vector<8x128xf32> to vector<8x32xf32>
    %198 = arith.mulf %195, %159 : vector<8x32xf32>
    %199 = arith.mulf %194, %196 : vector<8x32xf32>
    %200 = arith.addf %198, %199 : vector<8x32xf32>
    %201 = math.tanh %200 : vector<8x32xf32>
    %202 = arith.mulf %197, %201 : vector<8x32xf32>
    %cst_62 = arith.constant dense<0.000000e+00> : vector<8x128xf32>
    %203 = tpu.matmul %202, %4, %cst_62 {dimension_numbers = #tpu.dot_dimension_numbers<[1], [0], [0], [1], [0, 0, 1, 1], [], []>} : vector<8x32xf32>, vector<32x128xf32>, vector<8x128xf32> -> vector<8x128xf32>
    %cst_63 = arith.constant dense<0.000000e+00> : vector<8x128xf32>
    %204 = tpu.matmul %182, %5, %cst_63 {dimension_numbers = #tpu.dot_dimension_numbers<[1], [0], [0], [1], [0, 0, 1, 1], [], []>} : vector<8x32xf32>, vector<32x128xf32>, vector<8x128xf32> -> vector<8x128xf32>
    %205 = arith.addf %203, %204 : vector<8x128xf32>
    %206 = vector.broadcast %6 : vector<1x128xf32> to vector<8x128xf32>
    %207 = arith.addf %205, %206 : vector<8x128xf32>
    %208 = arith.mulf %207, %15 : vector<8x128xf32>
    %209 = math.tanh %208 : vector<8x128xf32>
    %cst_64 = arith.constant 5.000000e-01 : f32
    %210 = vector.broadcast %cst_64 : f32 to vector<8x128xf32>
    %211 = arith.mulf %210, %209 : vector<8x128xf32>
    %cst_65 = arith.constant 5.000000e-01 : f32
    %212 = vector.broadcast %cst_65 : f32 to vector<8x128xf32>
    %213 = arith.addf %211, %212 : vector<8x128xf32>
    %214 = arith.select %12, %209, %213 : vector<8x128xi1>, vector<8x128xf32>
    %215 = vector.extract_strided_slice %214 {offsets = [0, 0], sizes = [8, 32], strides = [1, 1]} : vector<8x128xf32> to vector<8x32xf32>
    %216 = vector.extract_strided_slice %214 {offsets = [0, 32], sizes = [8, 32], strides = [1, 1]} : vector<8x128xf32> to vector<8x32xf32>
    %217 = vector.extract_strided_slice %214 {offsets = [0, 64], sizes = [8, 32], strides = [1, 1]} : vector<8x128xf32> to vector<8x32xf32>
    %218 = vector.extract_strided_slice %214 {offsets = [0, 96], sizes = [8, 32], strides = [1, 1]} : vector<8x128xf32> to vector<8x32xf32>
    %219 = arith.mulf %216, %180 : vector<8x32xf32>
    %220 = arith.mulf %215, %217 : vector<8x32xf32>
    %221 = arith.addf %219, %220 : vector<8x32xf32>
    %222 = math.tanh %221 : vector<8x32xf32>
    %223 = arith.mulf %218, %222 : vector<8x32xf32>
    %c32_66 = arith.constant 32 : index
    %c0_67 = arith.constant 0 : index
    %224 = vector.load %arg6[%c32_66, %c0_67] : memref<64x32xf32, #tpu.memory_space<vmem>>, vector<8x32xf32>
    tpu.vector_store %arg6[%c32_66, %c0_67], %223 {strides = array<i32>} : memref<64x32xf32, #tpu.memory_space<vmem>>, vector<8x32xf32>,
    %c40 = arith.constant 40 : index
    %c0_68 = arith.constant 0 : index
    %225 = vector.load %arg1[%c40, %c0_68] : memref<64x128xf32, #tpu.memory_space<vmem>>, vector<8x128xf32>
    %cst_69 = arith.constant dense<0.000000e+00> : vector<8x128xf32>
    %226 = tpu.matmul %202, %3, %cst_69 {dimension_numbers = #tpu.dot_dimension_numbers<[1], [0], [0], [1], [0, 0, 1, 1], [], []>} : vector<8x32xf32>, vector<32x128xf32>, vector<8x128xf32> -> vector<8x128xf32>
    %227 = arith.addf %225, %226 : vector<8x128xf32>
    %228 = arith.mulf %227, %15 : vector<8x128xf32>
    %229 = math.tanh %228 : vector<8x128xf32>
    %cst_70 = arith.constant 5.000000e-01 : f32
    %230 = vector.broadcast %cst_70 : f32 to vector<8x128xf32>
    %231 = arith.mulf %230, %229 : vector<8x128xf32>
    %cst_71 = arith.constant 5.000000e-01 : f32
    %232 = vector.broadcast %cst_71 : f32 to vector<8x128xf32>
    %233 = arith.addf %231, %232 : vector<8x128xf32>
    %234 = arith.select %12, %229, %233 : vector<8x128xi1>, vector<8x128xf32>
    %235 = vector.extract_strided_slice %234 {offsets = [0, 0], sizes = [8, 32], strides = [1, 1]} : vector<8x128xf32> to vector<8x32xf32>
    %236 = vector.extract_strided_slice %234 {offsets = [0, 32], sizes = [8, 32], strides = [1, 1]} : vector<8x128xf32> to vector<8x32xf32>
    %237 = vector.extract_strided_slice %234 {offsets = [0, 64], sizes = [8, 32], strides = [1, 1]} : vector<8x128xf32> to vector<8x32xf32>
    %238 = vector.extract_strided_slice %234 {offsets = [0, 96], sizes = [8, 32], strides = [1, 1]} : vector<8x128xf32> to vector<8x32xf32>
    %239 = arith.mulf %236, %200 : vector<8x32xf32>
    %240 = arith.mulf %235, %237 : vector<8x32xf32>
    %241 = arith.addf %239, %240 : vector<8x32xf32>
    %242 = math.tanh %241 : vector<8x32xf32>
    %243 = arith.mulf %238, %242 : vector<8x32xf32>
    %cst_72 = arith.constant dense<0.000000e+00> : vector<8x128xf32>
    %244 = tpu.matmul %243, %4, %cst_72 {dimension_numbers = #tpu.dot_dimension_numbers<[1], [0], [0], [1], [0, 0, 1, 1], [], []>} : vector<8x32xf32>, vector<32x128xf32>, vector<8x128xf32> -> vector<8x128xf32>
    %cst_73 = arith.constant dense<0.000000e+00> : vector<8x128xf32>
    %245 = tpu.matmul %223, %5, %cst_73 {dimension_numbers = #tpu.dot_dimension_numbers<[1], [0], [0], [1], [0, 0, 1, 1], [], []>} : vector<8x32xf32>, vector<32x128xf32>, vector<8x128xf32> -> vector<8x128xf32>
    %246 = arith.addf %244, %245 : vector<8x128xf32>
    %247 = vector.broadcast %6 : vector<1x128xf32> to vector<8x128xf32>
    %248 = arith.addf %246, %247 : vector<8x128xf32>
    %249 = arith.mulf %248, %15 : vector<8x128xf32>
    %250 = math.tanh %249 : vector<8x128xf32>
    %cst_74 = arith.constant 5.000000e-01 : f32
    %251 = vector.broadcast %cst_74 : f32 to vector<8x128xf32>
    %252 = arith.mulf %251, %250 : vector<8x128xf32>
    %cst_75 = arith.constant 5.000000e-01 : f32
    %253 = vector.broadcast %cst_75 : f32 to vector<8x128xf32>
    %254 = arith.addf %252, %253 : vector<8x128xf32>
    %255 = arith.select %12, %250, %254 : vector<8x128xi1>, vector<8x128xf32>
    %256 = vector.extract_strided_slice %255 {offsets = [0, 0], sizes = [8, 32], strides = [1, 1]} : vector<8x128xf32> to vector<8x32xf32>
    %257 = vector.extract_strided_slice %255 {offsets = [0, 32], sizes = [8, 32], strides = [1, 1]} : vector<8x128xf32> to vector<8x32xf32>
    %258 = vector.extract_strided_slice %255 {offsets = [0, 64], sizes = [8, 32], strides = [1, 1]} : vector<8x128xf32> to vector<8x32xf32>
    %259 = vector.extract_strided_slice %255 {offsets = [0, 96], sizes = [8, 32], strides = [1, 1]} : vector<8x128xf32> to vector<8x32xf32>
    %260 = arith.mulf %257, %221 : vector<8x32xf32>
    %261 = arith.mulf %256, %258 : vector<8x32xf32>
    %262 = arith.addf %260, %261 : vector<8x32xf32>
    %263 = math.tanh %262 : vector<8x32xf32>
    %264 = arith.mulf %259, %263 : vector<8x32xf32>
    %c40_76 = arith.constant 40 : index
    %c0_77 = arith.constant 0 : index
    %265 = vector.load %arg6[%c40_76, %c0_77] : memref<64x32xf32, #tpu.memory_space<vmem>>, vector<8x32xf32>
    tpu.vector_store %arg6[%c40_76, %c0_77], %264 {strides = array<i32>} : memref<64x32xf32, #tpu.memory_space<vmem>>, vector<8x32xf32>,
    %c48 = arith.constant 48 : index
    %c0_78 = arith.constant 0 : index
    %266 = vector.load %arg1[%c48, %c0_78] : memref<64x128xf32, #tpu.memory_space<vmem>>, vector<8x128xf32>
    %cst_79 = arith.constant dense<0.000000e+00> : vector<8x128xf32>
    %267 = tpu.matmul %243, %3, %cst_79 {dimension_numbers = #tpu.dot_dimension_numbers<[1], [0], [0], [1], [0, 0, 1, 1], [], []>} : vector<8x32xf32>, vector<32x128xf32>, vector<8x128xf32> -> vector<8x128xf32>
    %268 = arith.addf %266, %267 : vector<8x128xf32>
    %269 = arith.mulf %268, %15 : vector<8x128xf32>
    %270 = math.tanh %269 : vector<8x128xf32>
    %cst_80 = arith.constant 5.000000e-01 : f32
    %271 = vector.broadcast %cst_80 : f32 to vector<8x128xf32>
    %272 = arith.mulf %271, %270 : vector<8x128xf32>
    %cst_81 = arith.constant 5.000000e-01 : f32
    %273 = vector.broadcast %cst_81 : f32 to vector<8x128xf32>
    %274 = arith.addf %272, %273 : vector<8x128xf32>
    %275 = arith.select %12, %270, %274 : vector<8x128xi1>, vector<8x128xf32>
    %276 = vector.extract_strided_slice %275 {offsets = [0, 0], sizes = [8, 32], strides = [1, 1]} : vector<8x128xf32> to vector<8x32xf32>
    %277 = vector.extract_strided_slice %275 {offsets = [0, 32], sizes = [8, 32], strides = [1, 1]} : vector<8x128xf32> to vector<8x32xf32>
    %278 = vector.extract_strided_slice %275 {offsets = [0, 64], sizes = [8, 32], strides = [1, 1]} : vector<8x128xf32> to vector<8x32xf32>
    %279 = vector.extract_strided_slice %275 {offsets = [0, 96], sizes = [8, 32], strides = [1, 1]} : vector<8x128xf32> to vector<8x32xf32>
    %280 = arith.mulf %277, %241 : vector<8x32xf32>
    %281 = arith.mulf %276, %278 : vector<8x32xf32>
    %282 = arith.addf %280, %281 : vector<8x32xf32>
    %283 = math.tanh %282 : vector<8x32xf32>
    %284 = arith.mulf %279, %283 : vector<8x32xf32>
    %cst_82 = arith.constant dense<0.000000e+00> : vector<8x128xf32>
    %285 = tpu.matmul %284, %4, %cst_82 {dimension_numbers = #tpu.dot_dimension_numbers<[1], [0], [0], [1], [0, 0, 1, 1], [], []>} : vector<8x32xf32>, vector<32x128xf32>, vector<8x128xf32> -> vector<8x128xf32>
    %cst_83 = arith.constant dense<0.000000e+00> : vector<8x128xf32>
    %286 = tpu.matmul %264, %5, %cst_83 {dimension_numbers = #tpu.dot_dimension_numbers<[1], [0], [0], [1], [0, 0, 1, 1], [], []>} : vector<8x32xf32>, vector<32x128xf32>, vector<8x128xf32> -> vector<8x128xf32>
    %287 = arith.addf %285, %286 : vector<8x128xf32>
    %288 = vector.broadcast %6 : vector<1x128xf32> to vector<8x128xf32>
    %289 = arith.addf %287, %288 : vector<8x128xf32>
    %290 = arith.mulf %289, %15 : vector<8x128xf32>
    %291 = math.tanh %290 : vector<8x128xf32>
    %cst_84 = arith.constant 5.000000e-01 : f32
    %292 = vector.broadcast %cst_84 : f32 to vector<8x128xf32>
    %293 = arith.mulf %292, %291 : vector<8x128xf32>
    %cst_85 = arith.constant 5.000000e-01 : f32
    %294 = vector.broadcast %cst_85 : f32 to vector<8x128xf32>
    %295 = arith.addf %293, %294 : vector<8x128xf32>
    %296 = arith.select %12, %291, %295 : vector<8x128xi1>, vector<8x128xf32>
    %297 = vector.extract_strided_slice %296 {offsets = [0, 0], sizes = [8, 32], strides = [1, 1]} : vector<8x128xf32> to vector<8x32xf32>
    %298 = vector.extract_strided_slice %296 {offsets = [0, 32], sizes = [8, 32], strides = [1, 1]} : vector<8x128xf32> to vector<8x32xf32>
    %299 = vector.extract_strided_slice %296 {offsets = [0, 64], sizes = [8, 32], strides = [1, 1]} : vector<8x128xf32> to vector<8x32xf32>
    %300 = vector.extract_strided_slice %296 {offsets = [0, 96], sizes = [8, 32], strides = [1, 1]} : vector<8x128xf32> to vector<8x32xf32>
    %301 = arith.mulf %298, %262 : vector<8x32xf32>
    %302 = arith.mulf %297, %299 : vector<8x32xf32>
    %303 = arith.addf %301, %302 : vector<8x32xf32>
    %304 = math.tanh %303 : vector<8x32xf32>
    %305 = arith.mulf %300, %304 : vector<8x32xf32>
    %c48_86 = arith.constant 48 : index
    %c0_87 = arith.constant 0 : index
    %306 = vector.load %arg6[%c48_86, %c0_87] : memref<64x32xf32, #tpu.memory_space<vmem>>, vector<8x32xf32>
    tpu.vector_store %arg6[%c48_86, %c0_87], %305 {strides = array<i32>} : memref<64x32xf32, #tpu.memory_space<vmem>>, vector<8x32xf32>,
    %c56 = arith.constant 56 : index
    %c0_88 = arith.constant 0 : index
    %307 = vector.load %arg1[%c56, %c0_88] : memref<64x128xf32, #tpu.memory_space<vmem>>, vector<8x128xf32>
    %cst_89 = arith.constant dense<0.000000e+00> : vector<8x128xf32>
    %308 = tpu.matmul %284, %3, %cst_89 {dimension_numbers = #tpu.dot_dimension_numbers<[1], [0], [0], [1], [0, 0, 1, 1], [], []>} : vector<8x32xf32>, vector<32x128xf32>, vector<8x128xf32> -> vector<8x128xf32>
    %309 = arith.addf %307, %308 : vector<8x128xf32>
    %310 = arith.mulf %309, %15 : vector<8x128xf32>
    %311 = math.tanh %310 : vector<8x128xf32>
    %cst_90 = arith.constant 5.000000e-01 : f32
    %312 = vector.broadcast %cst_90 : f32 to vector<8x128xf32>
    %313 = arith.mulf %312, %311 : vector<8x128xf32>
    %cst_91 = arith.constant 5.000000e-01 : f32
    %314 = vector.broadcast %cst_91 : f32 to vector<8x128xf32>
    %315 = arith.addf %313, %314 : vector<8x128xf32>
    %316 = arith.select %12, %311, %315 : vector<8x128xi1>, vector<8x128xf32>
    %317 = vector.extract_strided_slice %316 {offsets = [0, 0], sizes = [8, 32], strides = [1, 1]} : vector<8x128xf32> to vector<8x32xf32>
    %318 = vector.extract_strided_slice %316 {offsets = [0, 32], sizes = [8, 32], strides = [1, 1]} : vector<8x128xf32> to vector<8x32xf32>
    %319 = vector.extract_strided_slice %316 {offsets = [0, 64], sizes = [8, 32], strides = [1, 1]} : vector<8x128xf32> to vector<8x32xf32>
    %320 = vector.extract_strided_slice %316 {offsets = [0, 96], sizes = [8, 32], strides = [1, 1]} : vector<8x128xf32> to vector<8x32xf32>
    %321 = arith.mulf %318, %282 : vector<8x32xf32>
    %322 = arith.mulf %317, %319 : vector<8x32xf32>
    %323 = arith.addf %321, %322 : vector<8x32xf32>
    %324 = math.tanh %323 : vector<8x32xf32>
    %325 = arith.mulf %320, %324 : vector<8x32xf32>
    %cst_92 = arith.constant dense<0.000000e+00> : vector<8x128xf32>
    %326 = tpu.matmul %325, %4, %cst_92 {dimension_numbers = #tpu.dot_dimension_numbers<[1], [0], [0], [1], [0, 0, 1, 1], [], []>} : vector<8x32xf32>, vector<32x128xf32>, vector<8x128xf32> -> vector<8x128xf32>
    %cst_93 = arith.constant dense<0.000000e+00> : vector<8x128xf32>
    %327 = tpu.matmul %305, %5, %cst_93 {dimension_numbers = #tpu.dot_dimension_numbers<[1], [0], [0], [1], [0, 0, 1, 1], [], []>} : vector<8x32xf32>, vector<32x128xf32>, vector<8x128xf32> -> vector<8x128xf32>
    %328 = arith.addf %326, %327 : vector<8x128xf32>
    %329 = vector.broadcast %6 : vector<1x128xf32> to vector<8x128xf32>
    %330 = arith.addf %328, %329 : vector<8x128xf32>
    %331 = arith.mulf %330, %15 : vector<8x128xf32>
    %332 = math.tanh %331 : vector<8x128xf32>
    %cst_94 = arith.constant 5.000000e-01 : f32
    %333 = vector.broadcast %cst_94 : f32 to vector<8x128xf32>
    %334 = arith.mulf %333, %332 : vector<8x128xf32>
    %cst_95 = arith.constant 5.000000e-01 : f32
    %335 = vector.broadcast %cst_95 : f32 to vector<8x128xf32>
    %336 = arith.addf %334, %335 : vector<8x128xf32>
    %337 = arith.select %12, %332, %336 : vector<8x128xi1>, vector<8x128xf32>
    %338 = vector.extract_strided_slice %337 {offsets = [0, 0], sizes = [8, 32], strides = [1, 1]} : vector<8x128xf32> to vector<8x32xf32>
    %339 = vector.extract_strided_slice %337 {offsets = [0, 32], sizes = [8, 32], strides = [1, 1]} : vector<8x128xf32> to vector<8x32xf32>
    %340 = vector.extract_strided_slice %337 {offsets = [0, 64], sizes = [8, 32], strides = [1, 1]} : vector<8x128xf32> to vector<8x32xf32>
    %341 = vector.extract_strided_slice %337 {offsets = [0, 96], sizes = [8, 32], strides = [1, 1]} : vector<8x128xf32> to vector<8x32xf32>
    %342 = arith.mulf %339, %303 : vector<8x32xf32>
    %343 = arith.mulf %338, %340 : vector<8x32xf32>
    %344 = arith.addf %342, %343 : vector<8x32xf32>
    %345 = math.tanh %344 : vector<8x32xf32>
    %346 = arith.mulf %341, %345 : vector<8x32xf32>
    %c56_96 = arith.constant 56 : index
    %c0_97 = arith.constant 0 : index
    %347 = vector.load %arg6[%c56_96, %c0_97] : memref<64x32xf32, #tpu.memory_space<vmem>>, vector<8x32xf32>
    tpu.vector_store %arg6[%c56_96, %c0_97], %346 {strides = array<i32>} : memref<64x32xf32, #tpu.memory_space<vmem>>, vector<8x32xf32>,
    %c0_98 = arith.constant 0 : index
    %c0_99 = arith.constant 0 : index
    %348 = vector.load %arg7[%c0_98, %c0_99] : memref<8x32xf32, #tpu.memory_space<vmem>>, vector<8x32xf32>
    tpu.vector_store %arg7[%c0_98, %c0_99], %325 {strides = array<i32>} : memref<8x32xf32, #tpu.memory_space<vmem>>, vector<8x32xf32>,
    %c0_100 = arith.constant 0 : index
    %c0_101 = arith.constant 0 : index
    %349 = vector.load %arg8[%c0_100, %c0_101] : memref<8x32xf32, #tpu.memory_space<vmem>>, vector<8x32xf32>
    tpu.vector_store %arg8[%c0_100, %c0_101], %323 {strides = array<i32>} : memref<8x32xf32, #tpu.memory_space<vmem>>, vector<8x32xf32>,
    %c0_102 = arith.constant 0 : index
    %c0_103 = arith.constant 0 : index
    %350 = vector.load %arg9[%c0_102, %c0_103] : memref<8x32xf32, #tpu.memory_space<vmem>>, vector<8x32xf32>
    tpu.vector_store %arg9[%c0_102, %c0_103], %346 {strides = array<i32>} : memref<8x32xf32, #tpu.memory_space<vmem>>, vector<8x32xf32>,
    %c0_104 = arith.constant 0 : index
    %c0_105 = arith.constant 0 : index
    %351 = vector.load %arg10[%c0_104, %c0_105] : memref<8x32xf32, #tpu.memory_space<vmem>>, vector<8x32xf32>
    tpu.vector_store %arg10[%c0_104, %c0_105], %344 {strides = array<i32>} : memref<8x32xf32, #tpu.memory_space<vmem>>, vector<8x32xf32>,
    return
  }
  func.func @transform_0(%arg0: i32) -> (i32, i32) {
    %c0_i32 = arith.constant 0 : i32
    %c0_i32_0 = arith.constant 0 : i32
    return %arg0, %c0_i32 : i32, i32
  }
  func.func @transform_1(%arg0: i32) -> (i32, i32) {
    %c0_i32 = arith.constant 0 : i32
    %c0_i32_0 = arith.constant 0 : i32
    %c0_i32_1 = arith.constant 0 : i32
    return %c0_i32, %c0_i32_0 : i32, i32
  }
  func.func @transform_2(%arg0: i32) -> (i32, i32) {
    %c0_i32 = arith.constant 0 : i32
    %c0_i32_0 = arith.constant 0 : i32
    %c0_i32_1 = arith.constant 0 : i32
    return %c0_i32, %c0_i32_0 : i32, i32
  }
  func.func @transform_3(%arg0: i32) -> (i32, i32) {
    %c0_i32 = arith.constant 0 : i32
    %c0_i32_0 = arith.constant 0 : i32
    %c0_i32_1 = arith.constant 0 : i32
    return %c0_i32, %c0_i32_0 : i32, i32
  }
  func.func @transform_4(%arg0: i32) -> (i32, i32) {
    %c0_i32 = arith.constant 0 : i32
    %c0_i32_0 = arith.constant 0 : i32
    %c0_i32_1 = arith.constant 0 : i32
    return %c0_i32, %c0_i32_0 : i32, i32
  }
  func.func @transform_5(%arg0: i32) -> (i32, i32) {
    %c0_i32 = arith.constant 0 : i32
    %c0_i32_0 = arith.constant 0 : i32
    return %arg0, %c0_i32 : i32, i32
  }
}

</mosaic_0001>

<bundles_post_ra>
// kernel: tpu_custom_call.1
= control target key start
LH: loop header
LB: loop body
LE: loop exit
PB: predicated region body
PF: predicated region fallthrough
CT: control target
= control target key end

     0   :  { %10 = vsyncpa [#allocation7], 0  ;;  %s1685_s0 = inlined_call_operand.hbm [shape: f32[64,128], index: 0, kind: input, shape index: {}]   ;;  %s1686_s1 = inlined_call_operand.hbm [shape: f32[32,128], index: 1, kind: input, shape index: {}]   ;;  %s1687_s2 = inlined_call_operand.hbm [shape: f32[32,128], index: 2, kind: input, shape index: {}]   ;;  %s1688_s3 = inlined_call_operand.hbm [shape: f32[32,128], index: 3, kind: input, shape index: {}]   ;;  %s1689_s4 = inlined_call_operand.vmem [shape: f32[1,128], index: 4, kind: input, shape index: {}]   ;;  %s1690_s5 = inlined_call_operand.vmem [shape: f32[64,32], index: 5, kind: output, shape index: {}]  }
   0x1   :  { %11 = vsyncpa [#allocation9], 0 }
   0x2   :  { %12 = vsyncpa [#allocation12], 0  ;;  %s30_s20 = sshll.u32 %s1686_s1, 4  ;;  %s1305_s21 = smov [#allocation8]   ;;  %s31_s20 = int_to_ptr.hbm [resolvable:$true] %s30_s20 }
   0x3   :  { %s32_s22 = sshll.u32 %s1305_s21, 4  ;;  %s17_s25 = sshll.u32 %s1685_s0, 4  ;;  %s33_s22 = int_to_ptr.vmem [resolvable:$true] %s32_s22  ;;  %s18_s25 = int_to_ptr.hbm [resolvable:$true] %s17_s25 }
   0x4   :  { %s1306_s26 = smov 128   ;;  %s1307_s27 = smov 8  }
   0x5   :  { %38 = dma.hbm_to_vmem [thread:$0]  %s31_s20, 512, %s33_s22, [#allocation9], %s1306_s26, %s1306_s26, %s1307_s27  }
   0x6   :  { %s1308_s28 = smov [#allocation6]   ;;  %s43_s7 = sshll.u32 %s1687_s2, 4  ;;  %s44_s7 = int_to_ptr.hbm [resolvable:$true] %s43_s7 }
   0x7   :  { %s19_s29 = sshll.u32 %s1308_s28, 4  ;;  %s56_s9 = sshll.u32 %s1688_s3, 4  ;;  %s20_s29 = int_to_ptr.vmem [resolvable:$true] %s19_s29  ;;  %s57_s9 = int_to_ptr.hbm [resolvable:$true] %s56_s9 }
   0x8   :  { %25 = dma.hbm_to_vmem [thread:$0]  %s18_s25, 1024, %s20_s29, [#allocation7], %s1306_s26, %s1306_s26, %s1307_s27  }
   0x9   :  { %s1309_s10 = smov [#allocation10]   ;;  %s1310_s0 = smov [#allocation11]  }
   0xa   :  { %s45_s11 = sshll.u32 %s1309_s10, 4  ;;  %s58_s12 = sshll.u32 %s1310_s0, 4  ;;  %s46_s11 = int_to_ptr.vmem [resolvable:$true] %s45_s11  ;;  %s59_s12 = int_to_ptr.vmem [resolvable:$true] %s58_s12 }
   0xb   :  { %51 = dma.hbm_to_vmem [thread:$0]  %s44_s7, 512, %s46_s11, [#allocation9], %s1306_s26, %s1306_s26, %s1307_s27  }
   0xc   :  { %64 = dma.hbm_to_vmem [thread:$0]  %s57_s9, 512, %s59_s12, [#allocation12], %s1306_s26, %s1306_s26, %s1307_s27  }
   0xd   :  { %1299 = dma.done.wait [#allocation7], 1024  }
   0xe   :  { %1300 = vsyncadd [#allocation7], 4294966272 }
   0xf   :  { %1301 = dma.done.wait [#allocation9], 1024  }
  0x10   :  { %1302 = vsyncadd [#allocation9], 4294966272 }
  0x11   :  { %1303 = dma.done.wait [#allocation12], 512  }
  0x12   :  { %1304 = vsyncadd [#allocation12], 4294966784  ;;  %vm87_vm0 = vcmask 261120   ;;  %v1311_v0 = vmov 0.0   ;;  %v1362_v1 = vld [vmem:[#allocation8 + $0x18] sm:$0xff]  ;;  %v1364_v2 = vld [vmem:[#allocation8 + $0x10] sm:$0xff]  ;;  %v105_v6 = vlaneseq }
  0x13   :  { %88 = vst.msk [vmem:[#allocation2] sm:$0xff] %vm87_vm0, %v1311_v0  ;;  %132 = vmatpush.msra.mxu0 %v1362_v1  ;;  %263 = vmatpush.msra.mxu3 %v1362_v1  ;;  %v1368_v3 = vld [vmem:[#allocation8 + $0x8] sm:$0xff]  ;;  %v1372_v4 = vld [vmem:[#allocation8] sm:$0xff]  ;;  %v1312_v10 = vmov 0.5   ;;  %s1313_s2 = smov 64   ;;  %s1314_s3 = smov 32  }
  0x14   :  { %89 = vst.msk [vmem:[#allocation3] sm:$0xff] %vm87_vm0, %v1311_v0  ;;  %v106_v7 = vand.u32 127, %v105_v6  ;;  %v115_v9 = vld [vmem:[#allocation6] sm:$0xff]  ;;  %v1397_v27 = vld [vmem:[#allocation10 + $0x18] sm:$0xff]  ;;  %v1399_v28 = vld [vmem:[#allocation10 + $0x10] sm:$0xff]  ;;  %s1315_s28 = smov 96  }
  0x15   :  { %90 = vst.msk [vmem:[#allocation4] sm:$0xff] %vm87_vm0, %v1311_v0  ;;  %133 = vmatpush.msra.mxu0 %v1364_v2  ;;  %264 = vmatpush.msra.mxu3 %v1364_v2  ;;  %v1402_v29 = vld [vmem:[#allocation11 + $0x18] sm:$0xff]  ;;  %v1404_v30 = vld [vmem:[#allocation10 + $0x8] sm:$0xff]  ;;  %v1410_v31 = vld [vmem:[#allocation10] sm:$0xff] }
  0x16   :  { %91 = vst.msk [vmem:[#allocation5] sm:$0xff] %vm87_vm0, %v1311_v0  ;;  %vm107_vm1 = vcmp.ge.s32.totalorder %v106_v7, 64  ;;  %vm108_vm2 = vcmp.lt.s32.totalorder %v106_v7, 96  ;;  %207 = vmatpush.msra.mxu2 %v1397_v27  ;;  %182 = vmatpush.msra.mxu1 %v1402_v29  ;;  %v1419_v34 = vld [vmem:[#allocation11 + $0x10] sm:$0xff]  ;;  %v1421_v35 = vld [vmem:[#allocation11 + $0x8] sm:$0xff]  ;;  %v1425_v37 = vld [vmem:[#allocation11] sm:$0xff] }
  0x17   :  { %134 = vmatpush.msra.mxu0 %v1368_v3  ;;  %265 = vmatpush.msra.mxu3 %v1368_v3  ;;  %vm1379_vm3 = vmand %vm107_vm1, %vm108_vm2  ;;  %v250_v41 = vld [vmem:[#allocation6 + $0x8] sm:$0xff]  ;;  %v1461_v42 = vld [vmem:[%s1689_s4] ss:$0 sm:$0xff] }
  0x18   :  { %v1385_v11 = vsel %vm1379_vm3, 1.0, %v1312_v10  ;;  %208 = vmatpush.msra.mxu2 %v1399_v28  ;;  %183 = vmatpush.msra.mxu1 %v1419_v34 }
  0x19   :  { %135 = vmatpush.msra.mxu0 %v1372_v4  ;;  %266 = vmatpush.msra.mxu3 %v1372_v4 }
  0x1a   :  { %v111_v5 = vld [vmem:[#allocation2] sm:$0xff]  ;;  %209 = vmatpush.msra.mxu2 %v1404_v30  ;;  %184 = vmatpush.msra.mxu1 %v1421_v35 }
  0x1b   :  { %1103 = vmatmul.msk.f32.vlgmr.msra.gmra.mxu0 %vm87_vm0, %v111_v5  ;;  %v112_v19 = vld [vmem:[#allocation3] sm:$0xff]  ;;  %427 = vmatpush.msrb.mxu3 %v1402_v29 }
  0x1c   :  { %308 = vmatpush.msrb.mxu0 %v1402_v29  ;;  %210 = vmatpush.msra.mxu2 %v1410_v31  ;;  %v113_v38 = vld [vmem:[#allocation4] sm:$0xff] }
  0x1d   :  { %v114_v36 = vld [vmem:[#allocation5] sm:$0xff]  ;;  %428 = vmatpush.msrb.mxu3 %v1419_v34  ;;  %185 = vmatpush.msra.mxu1 %v1425_v37 }
  0x1e   :  { %382 = vmatpush.msrb.mxu2 %v1362_v1  ;;  %309 = vmatpush.msrb.mxu0 %v1419_v34 }
  0x1f   :  { %429 = vmatpush.msrb.mxu3 %v1421_v35  ;;  %1104 = vmatmul.msk.f32.vlgmr.msra.gmra.mxu1 %vm87_vm0, %v113_v38 }
  0x20   :  { %383 = vmatpush.msrb.mxu2 %v1364_v2  ;;  %310 = vmatpush.msrb.mxu0 %v1421_v35 }
  0x21   :  { %430 = vmatpush.msrb.mxu3 %v1425_v37  ;;  %333 = vmatpush.msrb.mxu1 %v1397_v27 }
  0x22   :  { %384 = vmatpush.msrb.mxu2 %v1368_v3  ;;  %311 = vmatpush.msrb.mxu0 %v1425_v37 }
  0x23   :  { %334 = vmatpush.msrb.mxu1 %v1399_v28 }
  0x24   :  { %385 = vmatpush.msrb.mxu2 %v1372_v4  ;;  %452 = vmatpush.msra.mxu0 %v1397_v27 }
  0x25   :  { %335 = vmatpush.msrb.mxu1 %v1404_v30 }
  0x26   :  { %453 = vmatpush.msra.mxu0 %v1399_v28 }
  0x27   :  { %336 = vmatpush.msrb.mxu1 %v1410_v31 }
  0x28   :  { %454 = vmatpush.msra.mxu0 %v1404_v30 }
  0x29   :  { %501 = vmatpush.msra.mxu1 %v1362_v1 }
  0x2a   :  { %455 = vmatpush.msra.mxu0 %v1410_v31 }
  0x2b   :  { %502 = vmatpush.msra.mxu1 %v1364_v2 }
  0x2d   :  { %503 = vmatpush.msra.mxu1 %v1368_v3 }
  0x2f   :  { %504 = vmatpush.msra.mxu1 %v1372_v4 }
  0x98   :  { %v137_v12 = vpop.f32.mrf.mxu0 }
  0x99   :  { %v140_v13 = vadd.f32 %v137_v12, %v115_v9 }
  0x9b   :  { %v141_v14 = vmul.f32 %v140_v13, %v1385_v11 }
  0x9c   :  { %v187_v40 = vpop.f32.mrf.mxu1 }
  0x9d   :  { %1139 = vtanh.f32 %v141_v14 }
  0xa3   :  { %v1140_v15 = vpop.eup %1139 }
  0xa4   :  { %v143_v16 = vmul.f32 0.5, %v1140_v15 }
  0xa6   :  { %v144_v17 = vadd.f32 0.5, %v143_v16 }
  0xa8   :  { %v145_v18 = vsel %vm1379_vm3, %v1140_v15, %v144_v17 }
  0xa9   :  { %152 = vrot.lane.b32.xlu0 %v145_v18, %s1313_s2 }
  0xb1   :  { %147 = vrot.lane.b32.xlu0 %v112_v19, %s1314_s3 }
 0x11b   :  { %v153_v20 = vpop.permute.xlu0 %152 }
 0x11c   :  { %v155_v21 = vmul.f32 %v153_v20, %v145_v18 }
 0x11e   :  { %157 = vrot.lane.b32.xlu1 %v155_v21, %s1314_s3 }
 0x123   :  { %v148_v22 = vpop.permute.xlu0 %147 }
 0x124   :  { %v150_v23 = vmul.f32 %v148_v22, %v145_v18 }
 0x190   :  { %v158_v24 = vpop.permute.xlu1 %157 }
 0x191   :  { %v1393_v25 = vadd.f32 %v158_v24, %v150_v23  ;;  %v369_v23 = vld [vmem:[#allocation6 + $0x10] sm:$0xff] }
 0x193   :  { %1141 = vtanh.f32 %v1393_v25 }
 0x199   :  { %v1142_v26 = vpop.eup %1141 }
 0x19a   :  { %163 = vrot.lane.b32.xlu1 %v1142_v26, %s1313_s2 }
 0x1a2   :  { %225 = vrot.lane.b32.xlu1 %v114_v36, %s1314_s3 }
 0x20c   :  { %v164_v32 = vpop.permute.xlu1 %163 }
 0x20d   :  { %v166_v33 = vmul.f32 %v164_v32, %v145_v18 }
 0x20f   :  { %191 = vrot.lane.b32.xlu2 %v166_v33, %s1314_s3 }
 0x214   :  { %v226_v62 = vpop.permute.xlu1 %225 }
 0x269   :  { %v192_v39 = vpop.permute.xlu2 %191 }
 0x26a   :  { %1105 = vmatmul.msk.f32.vlgmr.msra.gmra.mxu2 %vm87_vm0, %v192_v39  ;;  %1106 = vmatmul.msk.f32.vlgmr.msra.gmra.mxu3 %vm87_vm0, %v192_v39 }
 0x26b   :  { %571 = vmatpush.msra.mxu3 %v1397_v27  ;;  %546 = vmatpush.msra.mxu2 %v1402_v29 }
 0x26d   :  { %572 = vmatpush.msra.mxu3 %v1399_v28  ;;  %547 = vmatpush.msra.mxu2 %v1419_v34 }
 0x26f   :  { %573 = vmatpush.msra.mxu3 %v1404_v30  ;;  %548 = vmatpush.msra.mxu2 %v1421_v35 }
 0x271   :  { %574 = vmatpush.msra.mxu3 %v1410_v31  ;;  %549 = vmatpush.msra.mxu2 %v1425_v37 }
 0x2ed   :  { %v212_v43 = vpop.f32.mrf.mxu2  ;;  %v268_v44 = vpop.f32.mrf.mxu3 }
 0x2ee   :  { %v213_v45 = vadd.f32 %v212_v43, %v187_v40  ;;  %v271_v46 = vadd.f32 %v268_v44, %v250_v41 }
 0x2f0   :  { %v218_v47 = vadd.f32 %v1461_v42, %v213_v45  ;;  %v272_v48 = vmul.f32 %v271_v46, %v1385_v11 }
 0x2f2   :  { %v219_v49 = vmul.f32 %v218_v47, %v1385_v11  ;;  %1143 = vtanh.f32 %v272_v48 }
 0x2f4   :  { %1145 = vtanh.f32 %v219_v49 }
 0x2f8   :  { %v1144_v50 = vpop.eup %1143 }
 0x2f9   :  { %v274_v51 = vmul.f32 0.5, %v1144_v50 }
 0x2fa   :  { %v1146_v52 = vpop.eup %1145 }
 0x2fb   :  { %v275_v53 = vadd.f32 0.5, %v274_v51  ;;  %v221_v54 = vmul.f32 0.5, %v1146_v52 }
 0x2fd   :  { %v276_v55 = vsel %vm1379_vm3, %v1144_v50, %v275_v53  ;;  %v222_v56 = vadd.f32 0.5, %v221_v54 }
 0x2fe   :  { %279 = vrot.lane.b32.xlu0 %v276_v55, %s1313_s2  ;;  %v277_v7 = vmul.f32 %v276_v55, %v1393_v25 }
 0x2ff   :  { %v223_v57 = vsel %vm1379_vm3, %v1146_v52, %v222_v56 }
 0x300   :  { %230 = vrot.lane.b32.xlu2 %v223_v57, %s1313_s2  ;;  %v228_v63 = vmul.f32 %v226_v62, %v223_v57 }
 0x35a   :  { %v231_v58 = vpop.permute.xlu2 %230 }
 0x35b   :  { %v233_v59 = vmul.f32 %v231_v58, %v223_v57 }
 0x35d   :  { %235 = vrot.lane.b32.xlu2 %v233_v59, %s1314_s3 }
 0x370   :  { %v280_v60 = vpop.permute.xlu0 %279 }
 0x371   :  { %v282_v61 = vmul.f32 %v280_v60, %v276_v55 }
 0x373   :  { %284 = vrot.lane.b32.xlu0 %v282_v61, %s1314_s3 }
 0x3b7   :  { %v236_v0 = vpop.permute.xlu2 %235 }
 0x3b8   :  { %v238_v5 = vadd.f32 %v236_v0, %v228_v63  ;;  %v488_v63 = vld [vmem:[#allocation6 + $0x18] sm:$0xff] }
 0x3ba   :  { %1147 = vtanh.f32 %v238_v5 }
 0x3c0   :  { %v1148_v6 = vpop.eup %1147 }
 0x3c1   :  { %241 = vrot.lane.b32.xlu1 %v1148_v6, %s1313_s2 }
 0x3e5   :  { %v285_v9 = vpop.permute.xlu0 %284 }
 0x3e6   :  { %v287_v10 = vadd.f32 %v285_v9, %v277_v7 }
 0x3e8   :  { %1149 = vtanh.f32 %v287_v10 }
 0x3ee   :  { %v1150_v12 = vpop.eup %1149 }
 0x3ef   :  { %290 = vrot.lane.b32.xlu2 %v1150_v12, %s1313_s2 }
 0x433   :  { %v242_v13 = vpop.permute.xlu1 %241 }
 0x434   :  { %v244_v14 = vmul.f32 %v242_v13, %v223_v57 }
 0x436   :  { %246 = vrot.lane.b32.xlu0 %v244_v14, %s1314_s3 }
 0x449   :  { %v291_v15 = vpop.permute.xlu2 %290 }
 0x44a   :  { %v293_v16 = vmul.f32 %v291_v15, %v276_v55 }
 0x44c   :  { %317 = vrot.lane.b32.xlu1 %v293_v16, %s1314_s3 }
 0x4a8   :  { %v247_v17 = vpop.permute.xlu0 %246 }
 0x4a9   :  { %249 = vst.msk [vmem:[%s1690_s5] sm:$0xff] %vm87_vm0, %v247_v17  ;;  %1107 = vmatmul.msk.f32.vlgmr.msrb.gmra.mxu0 %vm87_vm0, %v247_v17 }
 0x4aa   :  { %620 = vmatpush.msrb.mxu0 %v1362_v1 }
 0x4ac   :  { %621 = vmatpush.msrb.mxu0 %v1364_v2 }
 0x4ae   :  { %622 = vmatpush.msrb.mxu0 %v1368_v3 }
 0x4b0   :  { %623 = vmatpush.msrb.mxu0 %v1372_v4 }
 0x4be   :  { %v318_v18 = vpop.permute.xlu1 %317 }
 0x4bf   :  { %1108 = vmatmul.msk.f32.vlgmr.msrb.gmra.mxu1 %vm87_vm0, %v318_v18  ;;  %1109 = vmatmul.msk.f32.vlgmr.msrb.gmra.mxu2 %vm87_vm0, %v318_v18 }
 0x4c0   :  { %690 = vmatpush.msrb.mxu2 %v1397_v27  ;;  %665 = vmatpush.msrb.mxu1 %v1402_v29 }
 0x4c2   :  { %691 = vmatpush.msrb.mxu2 %v1399_v28  ;;  %666 = vmatpush.msrb.mxu1 %v1419_v34 }
 0x4c4   :  { %692 = vmatpush.msrb.mxu2 %v1404_v30  ;;  %667 = vmatpush.msrb.mxu1 %v1421_v35 }
 0x4c6   :  { %693 = vmatpush.msrb.mxu2 %v1410_v31  ;;  %668 = vmatpush.msrb.mxu1 %v1425_v37 }
 0x526   :  { %v313_v19 = vpop.f32.mrf.mxu0 }
 0x53c   :  { %v338_v20 = vpop.f32.mrf.mxu1 }
 0x53d   :  { %v339_v21 = vadd.f32 %v338_v20, %v313_v19 }
 0x53f   :  { %v341_v22 = vadd.f32 %v1461_v42, %v339_v21 }
 0x541   :  { %v342_v24 = vmul.f32 %v341_v22, %v1385_v11 }
 0x542   :  { %v387_v25 = vpop.f32.mrf.mxu2 }
 0x543   :  { %1151 = vtanh.f32 %v342_v24  ;;  %v390_v26 = vadd.f32 %v387_v25, %v369_v23 }
 0x545   :  { %v391_v32 = vmul.f32 %v390_v26, %v1385_v11 }
 0x547   :  { %1153 = vtanh.f32 %v391_v32 }
 0x549   :  { %v1152_v33 = vpop.eup %1151 }
 0x54a   :  { %v344_v36 = vmul.f32 0.5, %v1152_v33 }
 0x54c   :  { %v345_v38 = vadd.f32 0.5, %v344_v36 }
 0x54d   :  { %v1154_v39 = vpop.eup %1153 }
 0x54e   :  { %v346_v40 = vsel %vm1379_vm3, %v1152_v33, %v345_v38  ;;  %v393_v41 = vmul.f32 0.5, %v1154_v39 }
 0x54f   :  { %349 = vrot.lane.b32.xlu2 %v346_v40, %s1313_s2  ;;  %v347_v49 = vmul.f32 %v346_v40, %v238_v5 }
 0x550   :  { %v394_v43 = vadd.f32 0.5, %v393_v41 }
 0x552   :  { %v395_v44 = vsel %vm1379_vm3, %v1154_v39, %v394_v43 }
 0x553   :  { %398 = vrot.lane.b32.xlu0 %v395_v44, %s1313_s2  ;;  %v396_v52 = vmul.f32 %v395_v44, %v287_v10 }
 0x5a9   :  { %v350_v45 = vpop.permute.xlu2 %349 }
 0x5aa   :  { %v352_v46 = vmul.f32 %v350_v45, %v346_v40 }
 0x5ac   :  { %354 = vrot.lane.b32.xlu1 %v352_v46, %s1314_s3 }
 0x5c5   :  { %v399_v47 = vpop.permute.xlu0 %398 }
 0x5c6   :  { %v401_v48 = vmul.f32 %v399_v47, %v395_v44 }
 0x5c8   :  { %403 = vrot.lane.b32.xlu2 %v401_v48, %s1314_s3 }
 0x61e   :  { %v355_v50 = vpop.permute.xlu1 %354 }
 0x61f   :  { %v1509_v51 = vadd.f32 %v355_v50, %v347_v49  ;;  %v607_v49 = vld [vmem:[#allocation6 + $0x20] sm:$0xff] }
 0x621   :  { %1155 = vtanh.f32 %v1509_v51 }
 0x622   :  { %v404_v53 = vpop.permute.xlu2 %403 }
 0x623   :  { %v406_v54 = vadd.f32 %v404_v53, %v396_v52 }
 0x625   :  { %1157 = vtanh.f32 %v406_v54 }
 0x627   :  { %v1156_v55 = vpop.eup %1155 }
 0x628   :  { %360 = vrot.lane.b32.xlu0 %v1156_v55, %s1313_s2 }
 0x62b   :  { %v1158_v56 = vpop.eup %1157 }
 0x62c   :  { %409 = vrot.lane.b32.xlu1 %v1158_v56, %s1313_s2 }
 0x69a   :  { %v361_v57 = vpop.permute.xlu0 %360 }
 0x69b   :  { %v363_v58 = vmul.f32 %v361_v57, %v346_v40 }
 0x69d   :  { %365 = vrot.lane.b32.xlu2 %v363_v58, %s1314_s3 }
 0x69e   :  { %v410_v59 = vpop.permute.xlu1 %409 }
 0x69f   :  { %v412_v60 = vmul.f32 %v410_v59, %v395_v44 }
 0x6a1   :  { %436 = vrot.lane.b32.xlu0 %v412_v60, %s1314_s3 }
 0x6f7   :  { %v366_v61 = vpop.permute.xlu2 %365 }
 0x6f8   :  { %368 = vst.msk [vmem:[%s1690_s5 + $0x8] sm:$0xff] %vm87_vm0, %v366_v61  ;;  %1110 = vmatmul.msk.f32.vlgmr.msrb.gmra.mxu3 %vm87_vm0, %v366_v61 }
 0x6f9   :  { %739 = vmatpush.msrb.mxu3 %v1362_v1 }
 0x6fb   :  { %740 = vmatpush.msrb.mxu3 %v1364_v2 }
 0x6fd   :  { %741 = vmatpush.msrb.mxu3 %v1368_v3 }
 0x6ff   :  { %742 = vmatpush.msrb.mxu3 %v1372_v4 }
 0x713   :  { %v437_v62 = vpop.permute.xlu0 %436 }
 0x714   :  { %1111 = vmatmul.msk.f32.vlgmr.msra.gmra.mxu0 %vm87_vm0, %v437_v62  ;;  %1112 = vmatmul.msk.f32.vlgmr.msra.gmra.mxu1 %vm87_vm0, %v437_v62 }
 0x715   :  { %809 = vmatpush.msra.mxu1 %v1397_v27  ;;  %784 = vmatpush.msra.mxu0 %v1402_v29 }
 0x717   :  { %810 = vmatpush.msra.mxu1 %v1399_v28  ;;  %785 = vmatpush.msra.mxu0 %v1419_v34 }
 0x719   :  { %811 = vmatpush.msra.mxu1 %v1404_v30  ;;  %786 = vmatpush.msra.mxu0 %v1421_v35 }
 0x71b   :  { %812 = vmatpush.msra.mxu1 %v1410_v31  ;;  %787 = vmatpush.msra.mxu0 %v1425_v37 }
 0x77b   :  { %v432_v0 = vpop.f32.mrf.mxu3 }
 0x791   :  { %v457_v5 = vpop.f32.mrf.mxu0  ;;  %v506_v6 = vpop.f32.mrf.mxu1 }
 0x792   :  { %v458_v7 = vadd.f32 %v457_v5, %v432_v0  ;;  %v509_v9 = vadd.f32 %v506_v6, %v488_v63 }
 0x794   :  { %v460_v10 = vadd.f32 %v1461_v42, %v458_v7  ;;  %v510_v12 = vmul.f32 %v509_v9, %v1385_v11 }
 0x796   :  { %v461_v13 = vmul.f32 %v460_v10, %v1385_v11  ;;  %1159 = vtanh.f32 %v510_v12 }
 0x798   :  { %1161 = vtanh.f32 %v461_v13 }
 0x79c   :  { %v1160_v14 = vpop.eup %1159 }
 0x79d   :  { %v512_v15 = vmul.f32 0.5, %v1160_v14 }
 0x79e   :  { %v1162_v16 = vpop.eup %1161 }
 0x79f   :  { %v513_v17 = vadd.f32 0.5, %v512_v15  ;;  %v463_v18 = vmul.f32 0.5, %v1162_v16 }
 0x7a1   :  { %v514_v19 = vsel %vm1379_vm3, %v1160_v14, %v513_v17  ;;  %v464_v20 = vadd.f32 0.5, %v463_v18 }
 0x7a2   :  { %517 = vrot.lane.b32.xlu2 %v514_v19, %s1313_s2  ;;  %v515_v26 = vmul.f32 %v514_v19, %v406_v54 }
 0x7a3   :  { %v465_v21 = vsel %vm1379_vm3, %v1162_v16, %v464_v20 }
 0x7a4   :  { %468 = vrot.lane.b32.xlu1 %v465_v21, %s1313_s2  ;;  %v466_v38 = vmul.f32 %v465_v21, %v1509_v51 }
 0x7fc   :  { %v518_v22 = vpop.permute.xlu2 %517 }
 0x7fd   :  { %v520_v23 = vmul.f32 %v518_v22, %v514_v19 }
 0x7ff   :  { %522 = vrot.lane.b32.xlu1 %v520_v23, %s1314_s3 }
 0x816   :  { %v469_v24 = vpop.permute.xlu1 %468 }
 0x817   :  { %v471_v25 = vmul.f32 %v469_v24, %v465_v21 }
 0x819   :  { %473 = vrot.lane.b32.xlu0 %v471_v25, %s1314_s3 }
 0x871   :  { %v523_v32 = vpop.permute.xlu1 %522 }
 0x872   :  { %v525_v33 = vadd.f32 %v523_v32, %v515_v26 }
 0x874   :  { %1163 = vtanh.f32 %v525_v33 }
 0x87a   :  { %v1164_v36 = vpop.eup %1163 }
 0x87b   :  { %528 = vrot.lane.b32.xlu0 %v1164_v36, %s1313_s2 }
 0x88b   :  { %v474_v39 = vpop.permute.xlu0 %473 }
 0x88c   :  { %v476_v40 = vadd.f32 %v474_v39, %v466_v38 }
 0x88e   :  { %1165 = vtanh.f32 %v476_v40 }
 0x894   :  { %v1166_v41 = vpop.eup %1165 }
 0x895   :  { %479 = vrot.lane.b32.xlu2 %v1166_v41, %s1313_s2 }
 0x8ed   :  { %v529_v43 = vpop.permute.xlu0 %528 }
 0x8ee   :  { %v531_v44 = vmul.f32 %v529_v43, %v514_v19 }
 0x8ef   :  { %v480_v45 = vpop.permute.xlu2 %479 }
 0x8f0   :  { %v482_v46 = vmul.f32 %v480_v45, %v465_v21  ;;  %555 = vrot.lane.b32.xlu2 %v531_v44, %s1314_s3 }
 0x8f2   :  { %484 = vrot.lane.b32.xlu1 %v482_v46, %s1314_s3 }
 0x94a   :  { %v556_v47 = vpop.permute.xlu2 %555 }
 0x94b   :  { %1114 = vmatmul.msk.f32.vlgmr.msra.gmra.mxu3 %vm87_vm0, %v556_v47  ;;  %1115 = vmatmul.msk.f32.vlgmr.msrb.gmra.mxu0 %vm87_vm0, %v556_v47 }
 0x94c   :  { %928 = vmatpush.msrb.mxu0 %v1397_v27  ;;  %903 = vmatpush.msra.mxu3 %v1402_v29 }
 0x94e   :  { %929 = vmatpush.msrb.mxu0 %v1399_v28  ;;  %904 = vmatpush.msra.mxu3 %v1419_v34 }
 0x950   :  { %930 = vmatpush.msrb.mxu0 %v1404_v30  ;;  %905 = vmatpush.msra.mxu3 %v1421_v35 }
 0x952   :  { %931 = vmatpush.msrb.mxu0 %v1410_v31  ;;  %906 = vmatpush.msra.mxu3 %v1425_v37 }
 0x964   :  { %v485_v48 = vpop.permute.xlu1 %484 }
 0x965   :  { %487 = vst.msk [vmem:[%s1690_s5 + $0x10] sm:$0xff] %vm87_vm0, %v485_v48  ;;  %1113 = vmatmul.msk.f32.vlgmr.msra.gmra.mxu2 %vm87_vm0, %v485_v48 }
 0x966   :  { %858 = vmatpush.msra.mxu2 %v1362_v1 }
 0x968   :  { %859 = vmatpush.msra.mxu2 %v1364_v2 }
 0x96a   :  { %860 = vmatpush.msra.mxu2 %v1368_v3 }
 0x96c   :  { %861 = vmatpush.msra.mxu2 %v1372_v4 }
 0x9c8   :  { %v625_v50 = vpop.f32.mrf.mxu0 }
 0x9c9   :  { %v628_v51 = vadd.f32 %v625_v50, %v607_v49 }
 0x9cb   :  { %v629_v52 = vmul.f32 %v628_v51, %v1385_v11 }
 0x9cd   :  { %1167 = vtanh.f32 %v629_v52 }
 0x9ce   :  { %v576_v57 = vpop.f32.mrf.mxu3 }
 0x9d3   :  { %v1168_v53 = vpop.eup %1167 }
 0x9d4   :  { %v631_v54 = vmul.f32 0.5, %v1168_v53 }
 0x9d6   :  { %v632_v55 = vadd.f32 0.5, %v631_v54 }
 0x9d8   :  { %v633_v56 = vsel %vm1379_vm3, %v1168_v53, %v632_v55 }
 0x9d9   :  { %636 = vrot.lane.b32.xlu0 %v633_v56, %s1313_s2  ;;  %v634_v12 = vmul.f32 %v633_v56, %v525_v33 }
 0x9e8   :  { %v551_v58 = vpop.f32.mrf.mxu2 }
 0x9e9   :  { %v577_v59 = vadd.f32 %v576_v57, %v551_v58  ;;  %v845_v58 = vld [vmem:[#allocation6 + $0x30] sm:$0xff] }
 0x9eb   :  { %v579_v60 = vadd.f32 %v1461_v42, %v577_v59 }
 0x9ed   :  { %v580_v61 = vmul.f32 %v579_v60, %v1385_v11 }
 0x9ef   :  { %1169 = vtanh.f32 %v580_v61 }
 0x9f5   :  { %v1170_v62 = vpop.eup %1169 }
 0x9f6   :  { %v582_v63 = vmul.f32 0.5, %v1170_v62 }
 0x9f8   :  { %v583_v0 = vadd.f32 0.5, %v582_v63 }
 0x9fa   :  { %v584_v5 = vsel %vm1379_vm3, %v1170_v62, %v583_v0 }
 0x9fb   :  { %587 = vrot.lane.b32.xlu1 %v584_v5, %s1313_s2  ;;  %v585_v16 = vmul.f32 %v584_v5, %v476_v40 }
 0xa4b   :  { %v637_v6 = vpop.permute.xlu0 %636 }
 0xa4c   :  { %v639_v7 = vmul.f32 %v637_v6, %v633_v56 }
 0xa4e   :  { %641 = vrot.lane.b32.xlu2 %v639_v7, %s1314_s3 }
 0xa6d   :  { %v588_v9 = vpop.permute.xlu1 %587 }
 0xa6e   :  { %v590_v10 = vmul.f32 %v588_v9, %v584_v5 }
 0xa70   :  { %592 = vrot.lane.b32.xlu0 %v590_v10, %s1314_s3 }
 0xaa8   :  { %v642_v13 = vpop.permute.xlu2 %641 }
 0xaa9   :  { %v644_v14 = vadd.f32 %v642_v13, %v634_v12 }
 0xaab   :  { %1171 = vtanh.f32 %v644_v14 }
 0xab1   :  { %v1172_v15 = vpop.eup %1171 }
 0xab2   :  { %647 = vrot.lane.b32.xlu1 %v1172_v15, %s1313_s2 }
 0xae2   :  { %v593_v17 = vpop.permute.xlu0 %592 }
 0xae3   :  { %v595_v18 = vadd.f32 %v593_v17, %v585_v16 }
 0xae5   :  { %1173 = vtanh.f32 %v595_v18 }
 0xaeb   :  { %v1174_v19 = vpop.eup %1173 }
 0xaec   :  { %598 = vrot.lane.b32.xlu2 %v1174_v19, %s1313_s2 }
 0xb24   :  { %v648_v20 = vpop.permute.xlu1 %647 }
 0xb25   :  { %v650_v21 = vmul.f32 %v648_v20, %v633_v56 }
 0xb27   :  { %674 = vrot.lane.b32.xlu0 %v650_v21, %s1314_s3 }
 0xb46   :  { %v599_v22 = vpop.permute.xlu2 %598 }
 0xb47   :  { %v601_v23 = vmul.f32 %v599_v22, %v584_v5 }
 0xb49   :  { %603 = vrot.lane.b32.xlu1 %v601_v23, %s1314_s3 }
 0xb99   :  { %v675_v24 = vpop.permute.xlu0 %674 }
 0xb9a   :  { %1117 = vmatmul.msk.f32.vlgmr.msrb.gmra.mxu2 %vm87_vm0, %v675_v24  ;;  %1118 = vmatmul.msk.f32.vlgmr.msrb.gmra.mxu3 %vm87_vm0, %v675_v24 }
 0xb9b   :  { %1047 = vmatpush.msrb.mxu3 %v1397_v27  ;;  %1022 = vmatpush.msrb.mxu2 %v1402_v29  ;;  %v726_v27 = vld [vmem:[#allocation6 + $0x28] sm:$0xff] }
 0xb9d   :  { %1048 = vmatpush.msrb.mxu3 %v1399_v28  ;;  %1023 = vmatpush.msrb.mxu2 %v1419_v34 }
 0xb9f   :  { %1049 = vmatpush.msrb.mxu3 %v1404_v30  ;;  %1024 = vmatpush.msrb.mxu2 %v1421_v35 }
 0xba1   :  { %1050 = vmatpush.msrb.mxu3 %v1410_v31  ;;  %1025 = vmatpush.msrb.mxu2 %v1425_v37 }
 0xbbb   :  { %v604_v25 = vpop.permute.xlu1 %603 }
 0xbbc   :  { %606 = vst.msk [vmem:[%s1690_s5 + $0x18] sm:$0xff] %vm87_vm0, %v604_v25  ;;  %1116 = vmatmul.msk.f32.vlgmr.msrb.gmra.mxu1 %vm87_vm0, %v604_v25 }
 0xbbd   :  { %977 = vmatpush.msrb.mxu1 %v1362_v1 }
 0xbbf   :  { %978 = vmatpush.msrb.mxu1 %v1364_v2 }
 0xbc1   :  { %979 = vmatpush.msrb.mxu1 %v1368_v3 }
 0xbc3   :  { %980 = vmatpush.msrb.mxu1 %v1372_v4 }
 0xc1d   :  { %v744_v28 = vpop.f32.mrf.mxu3  ;;  %v695_v1 = vpop.f32.mrf.mxu2 }
 0xc1e   :  { %v747_v29 = vadd.f32 %v744_v28, %v726_v27 }
 0xc20   :  { %v748_v30 = vmul.f32 %v747_v29, %v1385_v11 }
 0xc22   :  { %1175 = vtanh.f32 %v748_v30 }
 0xc28   :  { %v1176_v31 = vpop.eup %1175 }
 0xc29   :  { %v750_v34 = vmul.f32 0.5, %v1176_v31 }
 0xc2b   :  { %v751_v35 = vadd.f32 0.5, %v750_v34 }
 0xc2d   :  { %v752_v37 = vsel %vm1379_vm3, %v1176_v31, %v751_v35 }
 0xc2e   :  { %755 = vrot.lane.b32.xlu0 %v752_v37, %s1313_s2  ;;  %v753_v44 = vmul.f32 %v752_v37, %v644_v14 }
 0xc39   :  { %v670_v2 = vpop.f32.mrf.mxu1 }
 0xc3a   :  { %v696_v26 = vadd.f32 %v695_v1, %v670_v2  ;;  %v964_v2 = vld [vmem:[#allocation6 + $0x38] sm:$0xff] }
 0xc3c   :  { %v698_v3 = vadd.f32 %v1461_v42, %v696_v26 }
 0xc3e   :  { %v699_v4 = vmul.f32 %v698_v3, %v1385_v11 }
 0xc40   :  { %1177 = vtanh.f32 %v699_v4 }
 0xc46   :  { %v1178_v32 = vpop.eup %1177 }
 0xc47   :  { %v701_v33 = vmul.f32 0.5, %v1178_v32 }
 0xc49   :  { %v702_v36 = vadd.f32 0.5, %v701_v33 }
 0xc4b   :  { %v703_v38 = vsel %vm1379_vm3, %v1178_v32, %v702_v36 }
 0xc4c   :  { %706 = vrot.lane.b32.xlu2 %v703_v38, %s1313_s2  ;;  %v704_v48 = vmul.f32 %v703_v38, %v595_v18 }
 0xca0   :  { %v756_v39 = vpop.permute.xlu0 %755 }
 0xca1   :  { %v758_v40 = vmul.f32 %v756_v39, %v752_v37 }
 0xca3   :  { %760 = vrot.lane.b32.xlu2 %v758_v40, %s1314_s3 }
 0xca6   :  { %v707_v41 = vpop.permute.xlu2 %706 }
 0xca7   :  { %v709_v43 = vmul.f32 %v707_v41, %v703_v38 }
 0xca9   :  { %711 = vrot.lane.b32.xlu1 %v709_v43, %s1314_s3 }
 0xcfd   :  { %v761_v45 = vpop.permute.xlu2 %760 }
 0xcfe   :  { %v763_v46 = vadd.f32 %v761_v45, %v753_v44 }
 0xd00   :  { %1179 = vtanh.f32 %v763_v46 }
 0xd06   :  { %v1180_v47 = vpop.eup %1179 }
 0xd07   :  { %766 = vrot.lane.b32.xlu1 %v1180_v47, %s1313_s2 }
 0xd1b   :  { %v712_v49 = vpop.permute.xlu1 %711 }
 0xd1c   :  { %v714_v50 = vadd.f32 %v712_v49, %v704_v48 }
 0xd1e   :  { %1181 = vtanh.f32 %v714_v50 }
 0xd24   :  { %v1182_v51 = vpop.eup %1181 }
 0xd25   :  { %717 = vrot.lane.b32.xlu0 %v1182_v51, %s1313_s2 }
 0xd79   :  { %v767_v52 = vpop.permute.xlu1 %766 }
 0xd7a   :  { %v769_v53 = vmul.f32 %v767_v52, %v752_v37 }
 0xd7c   :  { %793 = vrot.lane.b32.xlu0 %v769_v53, %s1314_s3 }
 0xd97   :  { %v718_v54 = vpop.permute.xlu0 %717 }
 0xd98   :  { %v720_v55 = vmul.f32 %v718_v54, %v703_v38 }
 0xd9a   :  { %722 = vrot.lane.b32.xlu2 %v720_v55, %s1314_s3 }
 0xdee   :  { %v794_v56 = vpop.permute.xlu0 %793 }
 0xdef   :  { %1120 = vmatmul.msk.f32.vlgmr.msra.gmra.mxu1 %vm87_vm0, %v794_v56  ;;  %1121 = vmatmul.msk.f32.vlgmr.msra.gmra.mxu2 %vm87_vm0, %v794_v56 }
 0xdf4   :  { %v723_v57 = vpop.permute.xlu2 %722 }
 0xdf5   :  { %725 = vst.msk [vmem:[%s1690_s5 + $0x20] sm:$0xff] %vm87_vm0, %v723_v57  ;;  %1119 = vmatmul.msk.f32.vlgmr.msra.gmra.mxu0 %vm87_vm0, %v723_v57 }
 0xe6c   :  { %v814_v59 = vpop.f32.mrf.mxu1 }
 0xe72   :  { %v789_v60 = vpop.f32.mrf.mxu0  ;;  %v863_v61 = vpop.f32.mrf.mxu2 }
 0xe73   :  { %v815_v62 = vadd.f32 %v814_v59, %v789_v60  ;;  %v866_v63 = vadd.f32 %v863_v61, %v845_v58 }
 0xe75   :  { %v817_v0 = vadd.f32 %v1461_v42, %v815_v62  ;;  %v867_v5 = vmul.f32 %v866_v63, %v1385_v11 }
 0xe77   :  { %v818_v6 = vmul.f32 %v817_v0, %v1385_v11  ;;  %1183 = vtanh.f32 %v867_v5 }
 0xe79   :  { %1185 = vtanh.f32 %v818_v6 }
 0xe7d   :  { %v1184_v7 = vpop.eup %1183 }
 0xe7e   :  { %v869_v9 = vmul.f32 0.5, %v1184_v7 }
 0xe7f   :  { %v1186_v10 = vpop.eup %1185 }
 0xe80   :  { %v870_v12 = vadd.f32 0.5, %v869_v9  ;;  %v820_v13 = vmul.f32 0.5, %v1186_v10 }
 0xe82   :  { %v871_v14 = vsel %vm1379_vm3, %v1184_v7, %v870_v12  ;;  %v821_v15 = vadd.f32 0.5, %v820_v13 }
 0xe83   :  { %874 = vrot.lane.b32.xlu2 %v871_v14, %s1313_s2  ;;  %v872_v21 = vmul.f32 %v871_v14, %v763_v46 }
 0xe84   :  { %v822_v16 = vsel %vm1379_vm3, %v1186_v10, %v821_v15 }
 0xe85   :  { %825 = vrot.lane.b32.xlu1 %v822_v16, %s1313_s2  ;;  %v823_v25 = vmul.f32 %v822_v16, %v714_v50 }
 0xedd   :  { %v875_v17 = vpop.permute.xlu2 %874 }
 0xede   :  { %v877_v18 = vmul.f32 %v875_v17, %v871_v14 }
 0xee0   :  { %879 = vrot.lane.b32.xlu1 %v877_v18, %s1314_s3 }
 0xef7   :  { %v826_v19 = vpop.permute.xlu1 %825 }
 0xef8   :  { %v828_v20 = vmul.f32 %v826_v19, %v822_v16 }
 0xefa   :  { %830 = vrot.lane.b32.xlu0 %v828_v20, %s1314_s3 }
 0xf52   :  { %v880_v22 = vpop.permute.xlu1 %879 }
 0xf53   :  { %v882_v23 = vadd.f32 %v880_v22, %v872_v21 }
 0xf55   :  { %1187 = vtanh.f32 %v882_v23 }
 0xf5b   :  { %v1188_v24 = vpop.eup %1187 }
 0xf5c   :  { %885 = vrot.lane.b32.xlu0 %v1188_v24, %s1313_s2 }
 0xf6c   :  { %v831_v27 = vpop.permute.xlu0 %830 }
 0xf6d   :  { %v833_v28 = vadd.f32 %v831_v27, %v823_v25 }
 0xf6f   :  { %1189 = vtanh.f32 %v833_v28 }
 0xf75   :  { %v1190_v29 = vpop.eup %1189 }
 0xf76   :  { %836 = vrot.lane.b32.xlu2 %v1190_v29, %s1313_s2 }
 0xfce   :  { %v886_v30 = vpop.permute.xlu0 %885 }
 0xfcf   :  { %v888_v31 = vmul.f32 %v886_v30, %v871_v14 }
 0xfd0   :  { %v837_v34 = vpop.permute.xlu2 %836 }
 0xfd1   :  { %v839_v35 = vmul.f32 %v837_v34, %v822_v16  ;;  %912 = vrot.lane.b32.xlu2 %v888_v31, %s1314_s3 }
 0xfd3   :  { %841 = vrot.lane.b32.xlu1 %v839_v35, %s1314_s3 }
0x102b   :  { %v913_v37 = vpop.permute.xlu2 %912 }
0x102c   :  { %1123 = vmatmul.msk.f32.vlgmr.msrb.gmra.mxu0 %vm87_vm0, %v913_v37  ;;  %1124 = vmatmul.msk.f32.vlgmr.msrb.gmra.mxu1 %vm87_vm0, %v913_v37 }
0x1045   :  { %v842_v1 = vpop.permute.xlu1 %841 }
0x1046   :  { %844 = vst.msk [vmem:[%s1690_s5 + $0x28] sm:$0xff] %vm87_vm0, %v842_v1  ;;  %1122 = vmatmul.msk.f32.vlgmr.msra.gmra.mxu3 %vm87_vm0, %v842_v1 }
0x10a9   :  { %v982_v26 = vpop.f32.mrf.mxu1  ;;  %v933_v39 = vpop.f32.mrf.mxu0 }
0x10aa   :  { %v985_v3 = vadd.f32 %v982_v26, %v964_v2 }
0x10ac   :  { %v986_v4 = vmul.f32 %v985_v3, %v1385_v11 }
0x10ae   :  { %1191 = vtanh.f32 %v986_v4 }
0x10b4   :  { %v1192_v32 = vpop.eup %1191 }
0x10b5   :  { %v988_v33 = vmul.f32 0.5, %v1192_v32 }
0x10b7   :  { %v989_v36 = vadd.f32 0.5, %v988_v33 }
0x10b9   :  { %v990_v38 = vsel %vm1379_vm3, %v1192_v32, %v989_v36 }
0x10ba   :  { %993 = vrot.lane.b32.xlu1 %v990_v38, %s1313_s2  ;;  %v991_v53 = vmul.f32 %v990_v38, %v882_v23 }
0x10c9   :  { %v908_v40 = vpop.f32.mrf.mxu3 }
0x10ca   :  { %v934_v41 = vadd.f32 %v933_v39, %v908_v40 }
0x10cc   :  { %v936_v43 = vadd.f32 %v1461_v42, %v934_v41 }
0x10ce   :  { %v937_v44 = vmul.f32 %v936_v43, %v1385_v11 }
0x10d0   :  { %1193 = vtanh.f32 %v937_v44 }
0x10d6   :  { %v1194_v45 = vpop.eup %1193 }
0x10d7   :  { %v939_v46 = vmul.f32 0.5, %v1194_v45 }
0x10d9   :  { %v940_v47 = vadd.f32 0.5, %v939_v46 }
0x10db   :  { %v941_v48 = vsel %vm1379_vm3, %v1194_v45, %v940_v47 }
0x10dc   :  { %944 = vrot.lane.b32.xlu0 %v941_v48, %s1313_s2  ;;  %v942_v57 = vmul.f32 %v941_v48, %v833_v28 }
0x112c   :  { %v994_v49 = vpop.permute.xlu1 %993 }
0x112d   :  { %v996_v50 = vmul.f32 %v994_v49, %v990_v38 }
0x112f   :  { %998 = vrot.lane.b32.xlu0 %v996_v50, %s1314_s3 }
0x114e   :  { %v945_v51 = vpop.permute.xlu0 %944 }
0x114f   :  { %v947_v52 = vmul.f32 %v945_v51, %v941_v48 }
0x1151   :  { %949 = vrot.lane.b32.xlu2 %v947_v52, %s1314_s3 }
0x11a1   :  { %v999_v54 = vpop.permute.xlu0 %998 }
0x11a2   :  { %v1001_v55 = vadd.f32 %v999_v54, %v991_v53 }
0x11a4   :  { %1195 = vtanh.f32 %v1001_v55 }
0x11aa   :  { %v1196_v56 = vpop.eup %1195 }
0x11ab   :  { %v950_v58 = vpop.permute.xlu2 %949  ;;  %1004 = vrot.lane.b32.xlu2 %v1196_v56, %s1313_s2 }
0x11ac   :  { %v952_v59 = vadd.f32 %v950_v58, %v942_v57 }
0x11ae   :  { %1197 = vtanh.f32 %v952_v59 }
0x11b4   :  { %v1198_v60 = vpop.eup %1197 }
0x11b5   :  { %955 = vrot.lane.b32.xlu1 %v1198_v60, %s1313_s2 }
0x1205   :  { %v1005_v61 = vpop.permute.xlu2 %1004 }
0x1206   :  { %v1007_v62 = vmul.f32 %v1005_v61, %v990_v38 }
0x1208   :  { %1031 = vrot.lane.b32.xlu1 %v1007_v62, %s1314_s3 }
0x1227   :  { %v956_v63 = vpop.permute.xlu1 %955 }
0x1228   :  { %v958_v0 = vmul.f32 %v956_v63, %v941_v48 }
0x122a   :  { %960 = vrot.lane.b32.xlu0 %v958_v0, %s1314_s3 }
0x127a   :  { %v1032_v5 = vpop.permute.xlu1 %1031 }
0x127b   :  { %1084 = vst.msk [vmem:[#allocation2] sm:$0xff] %vm87_vm0, %v1032_v5  ;;  %1126 = vmatmul.msk.f32.vlgmr.msrb.gmra.mxu3 %vm87_vm0, %v1032_v5 }
0x129c   :  { %v961_v6 = vpop.permute.xlu0 %960 }
0x129d   :  { %963 = vst.msk [vmem:[%s1690_s5 + $0x30] sm:$0xff] %vm87_vm0, %v961_v6  ;;  %1125 = vmatmul.msk.f32.vlgmr.msrb.gmra.mxu2 %vm87_vm0, %v961_v6 }
0x12fe   :  { %v1052_v7 = vpop.f32.mrf.mxu3 }
0x1320   :  { %v1027_v9 = vpop.f32.mrf.mxu2 }
0x1321   :  { %v1053_v10 = vadd.f32 %v1052_v7, %v1027_v9 }
0x1323   :  { %v1055_v12 = vadd.f32 %v1461_v42, %v1053_v10 }
0x1325   :  { %v1056_v13 = vmul.f32 %v1055_v12, %v1385_v11 }
0x1327   :  { %1199 = vtanh.f32 %v1056_v13 }
0x132d   :  { %v1200_v14 = vpop.eup %1199 }
0x132e   :  { %v1058_v15 = vmul.f32 0.5, %v1200_v14 }
0x1330   :  { %v1059_v16 = vadd.f32 0.5, %v1058_v15 }
0x1332   :  { %v1060_v17 = vsel %vm1379_vm3, %v1200_v14, %v1059_v16 }
0x1333   :  { %1063 = vrot.lane.b32.xlu2 %v1060_v17, %s1313_s2  ;;  %v1061_v20 = vmul.f32 %v1060_v17, %v952_v59 }
0x138d   :  { %v1064_v18 = vpop.permute.xlu2 %1063 }
0x138e   :  { %v1066_v19 = vmul.f32 %v1064_v18, %v1060_v17 }
0x1390   :  { %1068 = vrot.lane.b32.xlu0 %v1066_v19, %s1314_s3 }
0x1398   :  { %1086 = vrot.lane.b32.xlu0 %v1001_v55, %s1315_s28 }
0x1402   :  { %v1069_v21 = vpop.permute.xlu0 %1068 }
0x1403   :  { %v1071_v42 = vadd.f32 %v1069_v21, %v1061_v20 }
0x1405   :  { %1201 = vtanh.f32 %v1071_v42 }
0x140a   :  { %v1087_v11 = vpop.permute.xlu0 %1086 }
0x140b   :  { %v1202_v22 = vpop.eup %1201  ;;  %1089 = vst.msk [vmem:[#allocation3] sm:$0xff] %vm87_vm0, %v1087_v11 }
0x140c   :  { %1074 = vrot.lane.b32.xlu1 %v1202_v22, %s1313_s2 }
0x1414   :  { %1092 = vrot.lane.b32.xlu1 %v1071_v42, %s1315_s28 }
0x147e   :  { %v1075_v8 = vpop.permute.xlu1 %1074 }
0x147f   :  { %v1077_v23 = vmul.f32 %v1075_v8, %v1060_v17 }
0x1481   :  { %1079 = vrot.lane.b32.xlu2 %v1077_v23, %s1314_s3 }
0x1486   :  { %v1093_v24 = vpop.permute.xlu1 %1092 }
0x1487   :  { %1095 = vst.msk [vmem:[#allocation5] sm:$0xff] %vm87_vm0, %v1093_v24 }
0x14db   :  { %v1080_v25 = vpop.permute.xlu2 %1079 }
0x14dc   :  { %1082 = vst.msk [vmem:[%s1690_s5 + $0x38] sm:$0xff] %vm87_vm0, %v1080_v25 }
0x14dd   :  { %1090 = vst.msk [vmem:[#allocation4] sm:$0xff] %vm87_vm0, %v1080_v25 }
0x14de   :  { %1100 = vsyncpa [#allocation7], 1 }
0x14df   :  { %1101 = vsyncpa [#allocation9], 1 }
0x14e0   :  { %1102 = vsyncpa [#allocation12], 1 }

</bundles_post_ra>
